<compile_context>
chip_gen: v6e
topology: v6e:2x2x1
jax: 0.10.0
libtpu: 0.0.40
codegen_flags: <defaults>
</compile_context>

<pallas_src>
import functools
import math

import jax
import jax.numpy as jnp
from jax.experimental import pallas as pl
from jax.experimental.pallas import tpu as pltpu

EPS = 1e-5              # PyTorch LayerNorm default eps
NEG_INF = -1e9          # additive key-padding mask value (exp underflows to 0 in f32)
_GELU_C = math.sqrt(2.0 / math.pi)


# ---------------------------------------------------------------- small helpers
def _round_up(x, m):
    return (x + m - 1) // m * m


def _bf16(x):
    return x.astype(jnp.bfloat16)


def _vmem_limit_bytes():
    """Per-core VMEM budget derived from hardware (v5e/v6e: 128 MiB, v7x: 64 MiB)."""
    try:
        cap = getattr(pltpu.get_tpu_info(), "vmem_capacity_bytes", None)
        if cap:
            return max(32 << 20, min(int(cap) * 3 // 4, 128 << 20))
    except Exception:
        pass
    return 48 * 1024 * 1024


def _pick_bblk(B, S, D, dff, budget, target_rows=640):
    """Batch-block size: aim for >=target_rows rows (MXU-bound regime), fit VMEM,
    and prefer >=2 batch blocks so both v7x TensorCores get work."""
    def est(bblk):
        M = bblk * S
        act = 3 * bblk * S * D * 4 + 2 * bblk * S * 4                    # h0(x2)+out slab+mask
        wts = 2 * (3 * D * D + D * D + 2 * D * dff) * 2 + 2 * (9 * D + dff) * 4
        tmp = M * (3 * D + 2 * D + dff) * 4 + 2 * bblk * S * S * 4        # qkv/ctx/ffn + scores
        return act + wts + tmp

    bblk = max(1, min(B, max(1, target_rows // max(S, 1))))
    while B % bblk:
        bblk -= 1
    while bblk > 1 and est(bblk) > budget:
        bblk -= 1
        while B % bblk:
            bblk -= 1
    if B // bblk < 2 and B >= 2:                      # feed both v7x TensorCores if cheap
        cand = bblk // 2
        while cand >= 1 and B % cand:
            cand -= 1
        if cand >= 1 and cand * S >= 256:
            bblk = cand
    return bblk


def _pick_vocab_tile(vp, D, budget):
    cap = max(128, min(vp, (budget // 4) // (2 * D * 2) // 128 * 128))
    best, t = 128, 128
    while t <= min(vp, cap):
        if vp % t == 0:
            best = t
        t += 128
    return best


def _pick_proj_rows(rows, D, tv, budget):
    def fits(rb):
        return (2 * rb * D * 4 + 2 * D * tv * 2 + 2 * tv * 4 + 2 * rb * tv * 4) <= budget
    divs = [d for d in range(rows, 0, -1) if rows % d == 0 and (d % 8 == 0 or d == rows)]
    for d in divs:
        if fits(d):
            return d
    return divs[-1]


# ---------------------------------------------------------------- math (f32)
def _layernorm(x, w, b):
    x = x.astype(jnp.float32)
    mu = jnp.mean(x, axis=-1, keepdims=True)
    var = jnp.mean(jnp.square(x - mu), axis=-1, keepdims=True)   # biased, like torch
    return (x - mu) * jax.lax.rsqrt(var + EPS) * w + b


def _softmax(x):
    m = jnp.max(x, axis=-1, keepdims=True)
    e = jnp.exp(x - m)
    return e * pl.reciprocal(jnp.sum(e, axis=-1, keepdims=True), approx=False)  # exact


def _gelu(x):
    # tanh-approximate GELU: tanh runs on the EUP slot (nearly free) vs an erf VPU polynomial.
    # TODO(synk): F.gelu's default is erf-exact; tanh form diverges by ~1e-3 max abs.
    return 0.5 * x * (1.0 + jnp.tanh(_GELU_C * (x + 0.044715 * x * x * x)))


# ---------------------------------------------------------------- fused transformer stack
def stack_kernel(h0_ref, mask_ref, wqkv_ref, wo_ref, w1_ref, w2_ref, vec_ref,
                 h_ref, *, nhead):
    # grid = (batch_blocks, num_layers); the layer axis is "arbitrary" so the output ref
    # (the activation slab) stays VMEM-resident across all layers of one batch block.
    layer = pl.program_id(1)

    @pl.when(layer == 0)
    def _():                         # seed the resident activation from the pre-LN'd embeddings
        h_ref[...] = h0_ref[...]

    x3 = h_ref[...]                                              # (Bblk, S, D) f32
    Bblk, S, D = x3.shape
    dff = w1_ref.shape[2]
    hd = D // nhead
    M = Bblk * S
    x = x3.reshape(M, D)

    # ---- unpack the per-layer small-vector slab (one DMA stream for 8 vectors) ----
    off = 0
    def vslice(w):
        nonlocal off
        v = vec_ref[0, :, off:off + w]                           # (1, w) f32, zero-cost ref slice
        off += w
        return v
    bqkv = vslice(3 * D); bo = vslice(D)
    ln1w = vslice(D); ln1b = vslice(D)
    b1 = vslice(dff); b2 = vslice(D)
    ln2w = vslice(D); ln2b = vslice(D)

    # ---- fused QKV projection (bf16 operands on MXU, f32 accumulate) ----
    qkv = jnp.dot(_bf16(x), wqkv_ref[0], preferred_element_type=jnp.float32) + bqkv
    scale = 1.0 / math.sqrt(hd)
    q = (qkv[:, :D] * scale).reshape(Bblk, S, D)                 # fold 1/sqrt(hd) into q once
    k = qkv[:, D:2 * D].reshape(Bblk, S, D)
    v = qkv[:, 2 * D:].reshape(Bblk, S, D)
    mask = mask_ref[...]                                         # (Bblk, 1, S) additive f32

    # ---- multi-head self attention ----
    # Per-head einsums batched over the batch block; per-head contexts are concatenated ONCE
    # into a full-width bf16 value (no attn scratch, no masked sub-128-lane stores).
    # TODO(synk): fully head-batched einsum / flash-style KV tiling for long S and nhead>=8.
    ctx_heads = []
    for h in range(nhead):                                       # nhead static -> unrolled
        sl = slice(h * hd, (h + 1) * hd)
        s = jnp.einsum('bqd,bkd->bqk', _bf16(q[:, :, sl]), _bf16(k[:, :, sl]),
                       preferred_element_type=jnp.float32)       # (Bblk, S, S)
        p = _softmax(s + mask)
        ctx_heads.append(_bf16(jnp.einsum('bqk,bkd->bqd', _bf16(p), _bf16(v[:, :, sl]),
                                          preferred_element_type=jnp.float32)))
    ctx = jnp.concatenate(ctx_heads, axis=-1).reshape(M, D)      # (M, D) bf16, full lane width
    attn = jnp.dot(ctx, wo_ref[0], preferred_element_type=jnp.float32) + bo

    # ---- residual + norm1 ----
    x = _layernorm(x + attn, ln1w, ln1b)

    # ---- feed forward ----
    h1 = _gelu(jnp.dot(_bf16(x), w1_ref[0], preferred_element_type=jnp.float32) + b1)
    h2 = jnp.dot(_bf16(h1), w2_ref[0], preferred_element_type=jnp.float32) + b2

    # ---- residual + norm2 (write back into the resident activation slab) ----
    h_ref[...] = _layernorm(x + h2, ln2w, ln2b).reshape(Bblk, S, D)


def transformer_stack(h0, mask_add, layers, nhead, bblk, vmem_limit):
    B, S, D = h0.shape
    L = layers["wqkv"].shape[0]
    nb = B // bblk

    def layer_spec(arr):
        tail = arr.shape[1:]
        zeros = (0,) * len(tail)
        return pl.BlockSpec((1,) + tail, lambda b, l, _z=zeros: (l,) + _z)

    in_specs = [
        pl.BlockSpec((bblk, S, D), lambda b, l: (b, 0, 0)),      # h0 (fetched once per block)
        pl.BlockSpec((bblk, 1, S), lambda b, l: (b, 0, 0)),      # additive key-padding mask
        layer_spec(layers["wqkv"]), layer_spec(layers["wo"]),
        layer_spec(layers["w1"]), layer_spec(layers["w2"]),
        layer_spec(layers["vecs"]),
    ]

    return pl.pallas_call(
        functools.partial(stack_kernel, nhead=nhead),
        out_shape=jax.ShapeDtypeStruct((B, S, D), jnp.float32),
        grid=(nb, L),
        in_specs=in_specs,
        out_specs=pl.BlockSpec((bblk, S, D), lambda b, l: (b, 0, 0)),
        input_output_aliases={0: 0},                             # h0 buffer reused for hidden
        compiler_params=pltpu.CompilerParams(
            dimension_semantics=("parallel", "arbitrary"),
            vmem_limit_bytes=vmem_limit),
    )(h0, mask_add, layers["wqkv"], layers["wo"], layers["w1"], layers["w2"], layers["vecs"])


# ---------------------------------------------------------------- tiled vocab projection
def proj_kernel(x_ref, w_ref, b_ref, o_ref):
    o_ref[...] = jnp.dot(_bf16(x_ref[...]), w_ref[...],
                         preferred_element_type=jnp.float32) + b_ref[...]


def output_projection(hidden, w_bf16, b_f32, vmem_limit):
    B, S, D = hidden.shape
    rows = B * S
    Vp = w_bf16.shape[1]
    budget = int(vmem_limit * 0.8)
    tv = _pick_vocab_tile(Vp, D, budget)
    rblk = _pick_proj_rows(rows, D, tv, budget)
    nr, nv = rows // rblk, Vp // tv
    x = hidden.reshape(rows, D)                                  # flatten rows for MXU fill
    out = pl.pallas_call(
        proj_kernel,
        out_shape=jax.ShapeDtypeStruct((rows, Vp), jnp.float32),
        grid=(nv, nr),     # rows innermost -> the (D, tv) weight tile stays VMEM-resident
        in_specs=[pl.BlockSpec((rblk, D), lambda v, r: (r, 0)),
                  pl.BlockSpec((D, tv), lambda v, r: (0, v)),
                  pl.BlockSpec((1, tv), lambda v, r: (0, v))],
        out_specs=pl.BlockSpec((rblk, tv), lambda v, r: (r, v)),
        compiler_params=pltpu.CompilerParams(
            dimension_semantics=("parallel", "arbitrary"),
            vmem_limit_bytes=vmem_limit),
    )(x, w_bf16, b_f32)
    return out.reshape(B, S, Vp)


# ---------------------------------------------------------------- parameters
def init_params(key, vocab_size, d_model, nhead, num_layers, dff, max_seq):
    std = 0.02
    keys = jax.random.split(key, 3 + num_layers)

    def nrm(k, shape):
        return jax.random.normal(k, shape, jnp.float32) * std

    vpad = _round_up(vocab_size, 128)
    out_w = jnp.pad(nrm(keys[2], (d_model, vocab_size)), ((0, 0), (0, vpad - vocab_size)))

    params = {
        "tok_emb": nrm(keys[0], (vocab_size, d_model)),
        "pos_emb": nrm(keys[1], (max_seq, d_model)),
        "ln_w": jnp.ones((d_model,), jnp.float32),
        "ln_b": jnp.zeros((d_model,), jnp.float32),
        "out_w": out_w.astype(jnp.bfloat16),                     # (D, Vp) bf16, lane-padded
        "out_b": jnp.zeros((1, vpad), jnp.float32),
    }

    wqkv, wo, w1, w2 = [], [], [], []
    for i in range(num_layers):
        lk = jax.random.split(keys[3 + i], 4)
        # weights stored (in, out) so kernels compute x @ W (== torch x @ W.T)
        wqkv.append(nrm(lk[0], (d_model, 3 * d_model)))
        wo.append(nrm(lk[1], (d_model, d_model)))
        w1.append(nrm(lk[2], (d_model, dff)))
        w2.append(nrm(lk[3], (dff, d_model)))

    # per-layer small vectors packed into one slab: [bqkv|bo|ln1w|ln1b|b1|b2|ln2w|ln2b]
    vec = jnp.concatenate([
        jnp.zeros((3 * d_model,)), jnp.zeros((d_model,)),
        jnp.ones((d_model,)), jnp.zeros((d_model,)),
        jnp.zeros((dff,)), jnp.zeros((d_model,)),
        jnp.ones((d_model,)), jnp.zeros((d_model,)),
    ]).astype(jnp.float32)[None, :]                              # (1, 9D+dff)

    params["layers"] = {
        "wqkv": jnp.stack(wqkv).astype(jnp.bfloat16),
        "wo": jnp.stack(wo).astype(jnp.bfloat16),
        "w1": jnp.stack(w1).astype(jnp.bfloat16),
        "w2": jnp.stack(w2).astype(jnp.bfloat16),
        "vecs": jnp.stack([vec] * num_layers),                   # (L, 1, 9D+dff) f32
    }
    return params


# ---------------------------------------------------------------- forward pass
@functools.partial(jax.jit, static_argnames=("nhead", "vocab_size", "pad_idx"))
def nlp_transformer_forward(params, input_ids, *, nhead, vocab_size, pad_idx=0,
                            attention_mask=None):
    B, S = input_ids.shape
    D = params["tok_emb"].shape[1]
    dff = params["layers"]["w1"].shape[2]

    # data-dependent embedding gather + pos add + (dropout=identity) + first LayerNorm stay
    # in plain JAX, so tok/pos are never pinned in VMEM across the layer sweep.
    tok = jnp.take(params["tok_emb"], input_ids, axis=0)         # (B, S, D)
    pos = params["pos_emb"][:S]
    h0 = _layernorm(tok + pos[None], params["ln_w"], params["ln_b"]).astype(jnp.float32)

    if attention_mask is None:
        attention_mask = (input_ids != pad_idx).astype(jnp.float32)
    # additive key-padding mask; a fully-padded row gives a uniform softmax instead of
    # PyTorch's NaN with an all-True key_padding_mask (benign divergence).
    mask_add = jnp.where(attention_mask == 0.0, NEG_INF, 0.0).astype(jnp.float32)[:, None, :]

    vmem_limit = _vmem_limit_bytes()
    bblk = _pick_bblk(B, S, D, dff, int(vmem_limit * 0.8))
    # TODO(synk): nn.Dropout layers are identity here (eval mode); no RNG dropout in-kernel.
    hidden = transformer_stack(h0, mask_add, params["layers"], nhead, bblk, vmem_limit)

    logits = output_projection(hidden, params["out_w"], params["out_b"], vmem_limit)
    # TODO(synk): for large vocabularies return the 128-padded logits and slice in the
    # consumer instead of materializing a second (B,S,V) array here.
    return logits[..., :vocab_size]


# ---------------------------------------------------------------- main
if __name__ == "__main__":
    vocab_size, d_model, nhead = 100, 32, 4
    num_layers, dff, max_seq = 2, 64, 16
    B, S = 2, 8

    key = jax.random.PRNGKey(0)
    pkey, ikey = jax.random.split(key)
    params = init_params(pkey, vocab_size, d_model, nhead, num_layers, dff, max_seq)

    input_ids = jax.random.randint(ikey, (B, S), 1, vocab_size, dtype=jnp.int32)
    input_ids = input_ids.at[1, -2:].set(0)   # pad tokens exercise key_padding_mask

    logits = nlp_transformer_forward(params, input_ids, nhead=nhead, vocab_size=vocab_size)
    jax.block_until_ready(logits)
    assert logits.shape == (B, S, vocab_size), logits.shape
    assert logits.dtype == jnp.float32
    assert bool(jnp.all(jnp.isfinite(logits)))
    print("KERNEL_OK")
</pallas_src>

<mosaic_0001>
module attributes {stable_mosaic.version = 11 : i64} {
  func.func @proj_kernel(%arg0: i32, %arg1: i32, %arg2: memref<16x32xf32, #tpu.memory_space<vmem>>, %arg3: memref<32x128xbf16, #tpu.memory_space<vmem>>, %arg4: memref<1x128xf32, #tpu.memory_space<vmem>>, %arg5: memref<16x128xf32, #tpu.memory_space<vmem>>) attributes {dimension_semantics = [#tpu.dimension_semantics<parallel>, #tpu.dimension_semantics<arbitrary>], iteration_bounds = array<i64: 1, 1>, scalar_prefetch = 0 : i64, scratch_operands = 0 : i64, tpu.core_type = #tpu.core_type<tc>, window_params = [{transform_indices = @transform_0, window_bounds = array<i64: 16, 32>}, {transform_indices = @transform_1, window_bounds = array<i64: 32, 128>}, {transform_indices = @transform_2, window_bounds = array<i64: 1, 128>}, {transform_indices = @transform_3, window_bounds = array<i64: 16, 128>}]} {
    %c0 = arith.constant 0 : index
    %c0_0 = arith.constant 0 : index
    %0 = vector.load %arg2[%c0, %c0_0] : memref<16x32xf32, #tpu.memory_space<vmem>>, vector<16x32xf32>
    %1 = arith.truncf %0 : vector<16x32xf32> to vector<16x32xbf16>
    %c0_1 = arith.constant 0 : index
    %c0_2 = arith.constant 0 : index
    %2 = vector.load %arg3[%c0_1, %c0_2] : memref<32x128xbf16, #tpu.memory_space<vmem>>, vector<32x128xbf16>
    %cst = arith.constant dense<0.000000e+00> : vector<16x128xf32>
    %3 = tpu.matmul %1, %2, %cst {dimension_numbers = #tpu.dot_dimension_numbers<[1], [0], [0], [1], [0, 0, 1, 1], [], []>} : vector<16x32xbf16>, vector<32x128xbf16>, vector<16x128xf32> -> vector<16x128xf32>
    %c0_3 = arith.constant 0 : index
    %c0_4 = arith.constant 0 : index
    %4 = vector.load %arg4[%c0_3, %c0_4] : memref<1x128xf32, #tpu.memory_space<vmem>>, vector<1x128xf32>
    %5 = vector.broadcast %4 : vector<1x128xf32> to vector<16x128xf32>
    %6 = arith.addf %3, %5 : vector<16x128xf32>
    %c0_5 = arith.constant 0 : index
    %c0_6 = arith.constant 0 : index
    %7 = vector.load %arg5[%c0_5, %c0_6] : memref<16x128xf32, #tpu.memory_space<vmem>>, vector<16x128xf32>
    tpu.vector_store %arg5[%c0_5, %c0_6], %6 {strides = array<i32>} : memref<16x128xf32, #tpu.memory_space<vmem>>, vector<16x128xf32>,
    return
  }
  func.func @transform_0(%arg0: i32, %arg1: i32) -> (i32, i32) {
    %c0_i32 = arith.constant 0 : i32
    %c0_i32_0 = arith.constant 0 : i32
    return %arg1, %c0_i32 : i32, i32
  }
  func.func @transform_1(%arg0: i32, %arg1: i32) -> (i32, i32) {
    %c0_i32 = arith.constant 0 : i32
    %c0_i32_0 = arith.constant 0 : i32
    return %c0_i32, %arg0 : i32, i32
  }
  func.func @transform_2(%arg0: i32, %arg1: i32) -> (i32, i32) {
    %c0_i32 = arith.constant 0 : i32
    %c0_i32_0 = arith.constant 0 : i32
    return %c0_i32, %arg0 : i32, i32
  }
  func.func @transform_3(%arg0: i32, %arg1: i32) -> (i32, i32) {
    %c0_i32 = arith.constant 0 : i32
    return %arg1, %arg0 : i32, i32
  }
}

module attributes {stable_mosaic.version = 11 : i64} {
  func.func @stack_kernel(%arg0: i32, %arg1: i32, %arg2: memref<2x8x32xf32, #tpu.memory_space<vmem>>, %arg3: memref<2x1x8xf32, #tpu.memory_space<vmem>>, %arg4: memref<1x32x96xbf16, #tpu.memory_space<vmem>>, %arg5: memref<1x32x32xbf16, #tpu.memory_space<vmem>>, %arg6: memref<1x32x64xbf16, #tpu.memory_space<vmem>>, %arg7: memref<1x64x32xbf16, #tpu.memory_space<vmem>>, %arg8: memref<1x1x352xf32, #tpu.memory_space<vmem>>, %arg9: memref<2x8x32xf32, #tpu.memory_space<vmem>>) attributes {dimension_semantics = [#tpu.dimension_semantics<parallel>, #tpu.dimension_semantics<arbitrary>], iteration_bounds = array<i64: 1, 2>, scalar_prefetch = 0 : i64, scratch_operands = 0 : i64, tpu.core_type = #tpu.core_type<tc>, window_params = [{transform_indices = @transform_0, window_bounds = array<i64: 2, 8, 32>}, {transform_indices = @transform_1, window_bounds = array<i64: 2, 1, 8>}, {transform_indices = @transform_2, window_bounds = array<i64: 1, 32, 96>}, {transform_indices = @transform_3, window_bounds = array<i64: 1, 32, 32>}, {transform_indices = @transform_4, window_bounds = array<i64: 1, 32, 64>}, {transform_indices = @transform_5, window_bounds = array<i64: 1, 64, 32>}, {transform_indices = @transform_6, window_bounds = array<i64: 1, 1, 352>}, {transform_indices = @transform_7, window_bounds = array<i64: 2, 8, 32>}]} {
    %c0_i32 = arith.constant 0 : i32
    %0 = arith.cmpi eq, %arg1, %c0_i32 : i32
    %1 = arith.extui %0 : i1 to i32
    %c0_i32_0 = arith.constant 0 : i32
    %2 = arith.cmpi ne, %1, %c0_i32_0 : i32
    scf.if %2 {
      %c0_72 = arith.constant 0 : index
      %c0_73 = arith.constant 0 : index
      %c0_74 = arith.constant 0 : index
      %204 = vector.load %arg2[%c0_72, %c0_73, %c0_74] : memref<2x8x32xf32, #tpu.memory_space<vmem>>, vector<2x8x32xf32>
      %c0_75 = arith.constant 0 : index
      %c0_76 = arith.constant 0 : index
      %c0_77 = arith.constant 0 : index
      %205 = vector.load %arg9[%c0_75, %c0_76, %c0_77] : memref<2x8x32xf32, #tpu.memory_space<vmem>>, vector<2x8x32xf32>
      tpu.vector_store %arg9[%c0_75, %c0_76, %c0_77], %204 {strides = array<i32>} : memref<2x8x32xf32, #tpu.memory_space<vmem>>, vector<2x8x32xf32>,
    } else {
    }
    %c0 = arith.constant 0 : index
    %c0_1 = arith.constant 0 : index
    %c0_2 = arith.constant 0 : index
    %3 = vector.load %arg9[%c0, %c0_1, %c0_2] : memref<2x8x32xf32, #tpu.memory_space<vmem>>, vector<2x8x32xf32>
    %4 = vector.shape_cast %3 : vector<2x8x32xf32> to vector<16x32xf32>
    %c0_3 = arith.constant 0 : index
    %c0_4 = arith.constant 0 : index
    %c0_5 = arith.constant 0 : index
    %5 = vector.load %arg8[%c0_3, %c0_4, %c0_5] : memref<1x1x352xf32, #tpu.memory_space<vmem>>, vector<1x1x96xf32>
    %6 = vector.shape_cast %5 : vector<1x1x96xf32> to vector<1x96xf32>
    %c0_6 = arith.constant 0 : index
    %c0_7 = arith.constant 0 : index
    %c96 = arith.constant 96 : index
    %7 = vector.load %arg8[%c0_6, %c0_7, %c96] : memref<1x1x352xf32, #tpu.memory_space<vmem>>, vector<1x1x32xf32>
    %8 = vector.shape_cast %7 : vector<1x1x32xf32> to vector<1x32xf32>
    %c0_8 = arith.constant 0 : index
    %c0_9 = arith.constant 0 : index
    %c128 = arith.constant 128 : index
    %9 = vector.load %arg8[%c0_8, %c0_9, %c128] : memref<1x1x352xf32, #tpu.memory_space<vmem>>, vector<1x1x32xf32>
    %10 = vector.shape_cast %9 : vector<1x1x32xf32> to vector<1x32xf32>
    %c0_10 = arith.constant 0 : index
    %c0_11 = arith.constant 0 : index
    %c160 = arith.constant 160 : index
    %11 = vector.load %arg8[%c0_10, %c0_11, %c160] : memref<1x1x352xf32, #tpu.memory_space<vmem>>, vector<1x1x32xf32>
    %12 = vector.shape_cast %11 : vector<1x1x32xf32> to vector<1x32xf32>
    %c0_12 = arith.constant 0 : index
    %c0_13 = arith.constant 0 : index
    %c192 = arith.constant 192 : index
    %13 = vector.load %arg8[%c0_12, %c0_13, %c192] : memref<1x1x352xf32, #tpu.memory_space<vmem>>, vector<1x1x64xf32>
    %14 = vector.shape_cast %13 : vector<1x1x64xf32> to vector<1x64xf32>
    %c0_14 = arith.constant 0 : index
    %c0_15 = arith.constant 0 : index
    %c256 = arith.constant 256 : index
    %15 = vector.load %arg8[%c0_14, %c0_15, %c256] : memref<1x1x352xf32, #tpu.memory_space<vmem>>, vector<1x1x32xf32>
    %16 = vector.shape_cast %15 : vector<1x1x32xf32> to vector<1x32xf32>
    %c0_16 = arith.constant 0 : index
    %c0_17 = arith.constant 0 : index
    %c288 = arith.constant 288 : index
    %17 = vector.load %arg8[%c0_16, %c0_17, %c288] : memref<1x1x352xf32, #tpu.memory_space<vmem>>, vector<1x1x32xf32>
    %18 = vector.shape_cast %17 : vector<1x1x32xf32> to vector<1x32xf32>
    %c0_18 = arith.constant 0 : index
    %c0_19 = arith.constant 0 : index
    %c320 = arith.constant 320 : index
    %19 = vector.load %arg8[%c0_18, %c0_19, %c320] : memref<1x1x352xf32, #tpu.memory_space<vmem>>, vector<1x1x32xf32>
    %20 = vector.shape_cast %19 : vector<1x1x32xf32> to vector<1x32xf32>
    %21 = arith.truncf %4 : vector<16x32xf32> to vector<16x32xbf16>
    %c0_20 = arith.constant 0 : index
    %c0_21 = arith.constant 0 : index
    %c0_22 = arith.constant 0 : index
    %22 = vector.load %arg4[%c0_20, %c0_21, %c0_22] : memref<1x32x96xbf16, #tpu.memory_space<vmem>>, vector<1x32x96xbf16>
    %23 = vector.shape_cast %22 : vector<1x32x96xbf16> to vector<32x96xbf16>
    %cst = arith.constant dense<0.000000e+00> : vector<16x96xf32>
    %24 = tpu.matmul %21, %23, %cst {dimension_numbers = #tpu.dot_dimension_numbers<[1], [0], [0], [1], [0, 0, 1, 1], [], []>} : vector<16x32xbf16>, vector<32x96xbf16>, vector<16x96xf32> -> vector<16x96xf32>
    %25 = vector.broadcast %6 : vector<1x96xf32> to vector<16x96xf32>
    %26 = arith.addf %24, %25 : vector<16x96xf32>
    %27 = vector.extract_strided_slice %26 {offsets = [0, 0], sizes = [16, 32], strides = [1, 1]} : vector<16x96xf32> to vector<16x32xf32>
    %cst_23 = arith.constant 0.353553385 : f32
    %28 = vector.broadcast %cst_23 : f32 to vector<16x32xf32>
    %29 = arith.mulf %27, %28 : vector<16x32xf32>
    %30 = vector.shape_cast %29 : vector<16x32xf32> to vector<2x8x32xf32>
    %31 = vector.extract_strided_slice %26 {offsets = [0, 32], sizes = [16, 32], strides = [1, 1]} : vector<16x96xf32> to vector<16x32xf32>
    %32 = vector.shape_cast %31 : vector<16x32xf32> to vector<2x8x32xf32>
    %33 = vector.extract_strided_slice %26 {offsets = [0, 64], sizes = [16, 32], strides = [1, 1]} : vector<16x96xf32> to vector<16x32xf32>
    %34 = vector.shape_cast %33 : vector<16x32xf32> to vector<2x8x32xf32>
    %c0_24 = arith.constant 0 : index
    %c0_25 = arith.constant 0 : index
    %c0_26 = arith.constant 0 : index
    %35 = vector.load %arg3[%c0_24, %c0_25, %c0_26] : memref<2x1x8xf32, #tpu.memory_space<vmem>>, vector<2x1x8xf32>
    %36 = vector.extract_strided_slice %30 {offsets = [0, 0, 0], sizes = [2, 8, 8], strides = [1, 1, 1]} : vector<2x8x32xf32> to vector<2x8x8xf32>
    %37 = arith.truncf %36 : vector<2x8x8xf32> to vector<2x8x8xbf16>
    %38 = vector.extract_strided_slice %32 {offsets = [0, 0, 0], sizes = [2, 8, 8], strides = [1, 1, 1]} : vector<2x8x32xf32> to vector<2x8x8xf32>
    %39 = arith.truncf %38 : vector<2x8x8xf32> to vector<2x8x8xbf16>
    "tpu.trace_start"() <{level = 10 : i32, message = "bqd,bkd->bqk"}> : () -> ()
    %cst_27 = arith.constant dense<0.000000e+00> : vector<2x8x8xf32>
    %40 = tpu.matmul %37, %39, %cst_27 {dimension_numbers = #tpu.dot_dimension_numbers<[2], [2], [1], [1], [0, 0, 0, 1, 1, 1], [0], [0]>} : vector<2x8x8xbf16>, vector<2x8x8xbf16>, vector<2x8x8xf32> -> vector<2x8x8xf32>
    "tpu.trace_stop"() : () -> ()
    %41 = vector.broadcast %35 : vector<2x1x8xf32> to vector<2x8x8xf32>
    %42 = arith.addf %40, %41 : vector<2x8x8xf32>
    %cst_28 = arith.constant dense<0xFF800000> : vector<2x8xf32>
    %43 = vector.multi_reduction <maximumf>, %42, %cst_28 [2] : vector<2x8x8xf32> to vector<2x8xf32>
    %44 = vector.shape_cast %43 : vector<2x8xf32> to vector<2x8x1xf32>
    %45 = vector.broadcast %44 : vector<2x8x1xf32> to vector<2x8x8xf32>
    %46 = arith.subf %42, %45 : vector<2x8x8xf32>
    %47 = math.exp %46 : vector<2x8x8xf32>
    %cst_29 = arith.constant dense<0.000000e+00> : vector<2x8xf32>
    %48 = vector.multi_reduction <add>, %47, %cst_29 [2] : vector<2x8x8xf32> to vector<2x8xf32>
    %49 = vector.shape_cast %48 : vector<2x8xf32> to vector<2x8x1xf32>
    %50 = tpu.reciprocal %49 : vector<2x8x1xf32> -> vector<2x8x1xf32>
    %51 = vector.broadcast %50 : vector<2x8x1xf32> to vector<2x8x8xf32>
    %52 = arith.mulf %47, %51 : vector<2x8x8xf32>
    %53 = arith.truncf %52 : vector<2x8x8xf32> to vector<2x8x8xbf16>
    %54 = vector.extract_strided_slice %34 {offsets = [0, 0, 0], sizes = [2, 8, 8], strides = [1, 1, 1]} : vector<2x8x32xf32> to vector<2x8x8xf32>
    %55 = arith.truncf %54 : vector<2x8x8xf32> to vector<2x8x8xbf16>
    "tpu.trace_start"() <{level = 10 : i32, message = "bqk,bkd->bqd"}> : () -> ()
    %cst_30 = arith.constant dense<0.000000e+00> : vector<2x8x8xf32>
    %56 = tpu.matmul %53, %55, %cst_30 {dimension_numbers = #tpu.dot_dimension_numbers<[2], [1], [1], [2], [0, 0, 0, 1, 1, 2], [0], [0]>} : vector<2x8x8xbf16>, vector<2x8x8xbf16>, vector<2x8x8xf32> -> vector<2x8x8xf32>
    "tpu.trace_stop"() : () -> ()
    %57 = arith.truncf %56 : vector<2x8x8xf32> to vector<2x8x8xbf16>
    %58 = vector.extract_strided_slice %30 {offsets = [0, 0, 8], sizes = [2, 8, 8], strides = [1, 1, 1]} : vector<2x8x32xf32> to vector<2x8x8xf32>
    %59 = arith.truncf %58 : vector<2x8x8xf32> to vector<2x8x8xbf16>
    %60 = vector.extract_strided_slice %32 {offsets = [0, 0, 8], sizes = [2, 8, 8], strides = [1, 1, 1]} : vector<2x8x32xf32> to vector<2x8x8xf32>
    %61 = arith.truncf %60 : vector<2x8x8xf32> to vector<2x8x8xbf16>
    "tpu.trace_start"() <{level = 10 : i32, message = "bqd,bkd->bqk"}> : () -> ()
    %cst_31 = arith.constant dense<0.000000e+00> : vector<2x8x8xf32>
    %62 = tpu.matmul %59, %61, %cst_31 {dimension_numbers = #tpu.dot_dimension_numbers<[2], [2], [1], [1], [0, 0, 0, 1, 1, 1], [0], [0]>} : vector<2x8x8xbf16>, vector<2x8x8xbf16>, vector<2x8x8xf32> -> vector<2x8x8xf32>
    "tpu.trace_stop"() : () -> ()
    %63 = vector.broadcast %35 : vector<2x1x8xf32> to vector<2x8x8xf32>
    %64 = arith.addf %62, %63 : vector<2x8x8xf32>
    %cst_32 = arith.constant dense<0xFF800000> : vector<2x8xf32>
    %65 = vector.multi_reduction <maximumf>, %64, %cst_32 [2] : vector<2x8x8xf32> to vector<2x8xf32>
    %66 = vector.shape_cast %65 : vector<2x8xf32> to vector<2x8x1xf32>
    %67 = vector.broadcast %66 : vector<2x8x1xf32> to vector<2x8x8xf32>
    %68 = arith.subf %64, %67 : vector<2x8x8xf32>
    %69 = math.exp %68 : vector<2x8x8xf32>
    %cst_33 = arith.constant dense<0.000000e+00> : vector<2x8xf32>
    %70 = vector.multi_reduction <add>, %69, %cst_33 [2] : vector<2x8x8xf32> to vector<2x8xf32>
    %71 = vector.shape_cast %70 : vector<2x8xf32> to vector<2x8x1xf32>
    %72 = tpu.reciprocal %71 : vector<2x8x1xf32> -> vector<2x8x1xf32>
    %73 = vector.broadcast %72 : vector<2x8x1xf32> to vector<2x8x8xf32>
    %74 = arith.mulf %69, %73 : vector<2x8x8xf32>
    %75 = arith.truncf %74 : vector<2x8x8xf32> to vector<2x8x8xbf16>
    %76 = vector.extract_strided_slice %34 {offsets = [0, 0, 8], sizes = [2, 8, 8], strides = [1, 1, 1]} : vector<2x8x32xf32> to vector<2x8x8xf32>
    %77 = arith.truncf %76 : vector<2x8x8xf32> to vector<2x8x8xbf16>
    "tpu.trace_start"() <{level = 10 : i32, message = "bqk,bkd->bqd"}> : () -> ()
    %cst_34 = arith.constant dense<0.000000e+00> : vector<2x8x8xf32>
    %78 = tpu.matmul %75, %77, %cst_34 {dimension_numbers = #tpu.dot_dimension_numbers<[2], [1], [1], [2], [0, 0, 0, 1, 1, 2], [0], [0]>} : vector<2x8x8xbf16>, vector<2x8x8xbf16>, vector<2x8x8xf32> -> vector<2x8x8xf32>
    "tpu.trace_stop"() : () -> ()
    %79 = arith.truncf %78 : vector<2x8x8xf32> to vector<2x8x8xbf16>
    %80 = vector.extract_strided_slice %30 {offsets = [0, 0, 16], sizes = [2, 8, 8], strides = [1, 1, 1]} : vector<2x8x32xf32> to vector<2x8x8xf32>
    %81 = arith.truncf %80 : vector<2x8x8xf32> to vector<2x8x8xbf16>
    %82 = vector.extract_strided_slice %32 {offsets = [0, 0, 16], sizes = [2, 8, 8], strides = [1, 1, 1]} : vector<2x8x32xf32> to vector<2x8x8xf32>
    %83 = arith.truncf %82 : vector<2x8x8xf32> to vector<2x8x8xbf16>
    "tpu.trace_start"() <{level = 10 : i32, message = "bqd,bkd->bqk"}> : () -> ()
    %cst_35 = arith.constant dense<0.000000e+00> : vector<2x8x8xf32>
    %84 = tpu.matmul %81, %83, %cst_35 {dimension_numbers = #tpu.dot_dimension_numbers<[2], [2], [1], [1], [0, 0, 0, 1, 1, 1], [0], [0]>} : vector<2x8x8xbf16>, vector<2x8x8xbf16>, vector<2x8x8xf32> -> vector<2x8x8xf32>
    "tpu.trace_stop"() : () -> ()
    %85 = vector.broadcast %35 : vector<2x1x8xf32> to vector<2x8x8xf32>
    %86 = arith.addf %84, %85 : vector<2x8x8xf32>
    %cst_36 = arith.constant dense<0xFF800000> : vector<2x8xf32>
    %87 = vector.multi_reduction <maximumf>, %86, %cst_36 [2] : vector<2x8x8xf32> to vector<2x8xf32>
    %88 = vector.shape_cast %87 : vector<2x8xf32> to vector<2x8x1xf32>
    %89 = vector.broadcast %88 : vector<2x8x1xf32> to vector<2x8x8xf32>
    %90 = arith.subf %86, %89 : vector<2x8x8xf32>
    %91 = math.exp %90 : vector<2x8x8xf32>
    %cst_37 = arith.constant dense<0.000000e+00> : vector<2x8xf32>
    %92 = vector.multi_reduction <add>, %91, %cst_37 [2] : vector<2x8x8xf32> to vector<2x8xf32>
    %93 = vector.shape_cast %92 : vector<2x8xf32> to vector<2x8x1xf32>
    %94 = tpu.reciprocal %93 : vector<2x8x1xf32> -> vector<2x8x1xf32>
    %95 = vector.broadcast %94 : vector<2x8x1xf32> to vector<2x8x8xf32>
    %96 = arith.mulf %91, %95 : vector<2x8x8xf32>
    %97 = arith.truncf %96 : vector<2x8x8xf32> to vector<2x8x8xbf16>
    %98 = vector.extract_strided_slice %34 {offsets = [0, 0, 16], sizes = [2, 8, 8], strides = [1, 1, 1]} : vector<2x8x32xf32> to vector<2x8x8xf32>
    %99 = arith.truncf %98 : vector<2x8x8xf32> to vector<2x8x8xbf16>
    "tpu.trace_start"() <{level = 10 : i32, message = "bqk,bkd->bqd"}> : () -> ()
    %cst_38 = arith.constant dense<0.000000e+00> : vector<2x8x8xf32>
    %100 = tpu.matmul %97, %99, %cst_38 {dimension_numbers = #tpu.dot_dimension_numbers<[2], [1], [1], [2], [0, 0, 0, 1, 1, 2], [0], [0]>} : vector<2x8x8xbf16>, vector<2x8x8xbf16>, vector<2x8x8xf32> -> vector<2x8x8xf32>
    "tpu.trace_stop"() : () -> ()
    %101 = arith.truncf %100 : vector<2x8x8xf32> to vector<2x8x8xbf16>
    %102 = vector.extract_strided_slice %30 {offsets = [0, 0, 24], sizes = [2, 8, 8], strides = [1, 1, 1]} : vector<2x8x32xf32> to vector<2x8x8xf32>
    %103 = arith.truncf %102 : vector<2x8x8xf32> to vector<2x8x8xbf16>
    %104 = vector.extract_strided_slice %32 {offsets = [0, 0, 24], sizes = [2, 8, 8], strides = [1, 1, 1]} : vector<2x8x32xf32> to vector<2x8x8xf32>
    %105 = arith.truncf %104 : vector<2x8x8xf32> to vector<2x8x8xbf16>
    "tpu.trace_start"() <{level = 10 : i32, message = "bqd,bkd->bqk"}> : () -> ()
    %cst_39 = arith.constant dense<0.000000e+00> : vector<2x8x8xf32>
    %106 = tpu.matmul %103, %105, %cst_39 {dimension_numbers = #tpu.dot_dimension_numbers<[2], [2], [1], [1], [0, 0, 0, 1, 1, 1], [0], [0]>} : vector<2x8x8xbf16>, vector<2x8x8xbf16>, vector<2x8x8xf32> -> vector<2x8x8xf32>
    "tpu.trace_stop"() : () -> ()
    %107 = vector.broadcast %35 : vector<2x1x8xf32> to vector<2x8x8xf32>
    %108 = arith.addf %106, %107 : vector<2x8x8xf32>
    %cst_40 = arith.constant dense<0xFF800000> : vector<2x8xf32>
    %109 = vector.multi_reduction <maximumf>, %108, %cst_40 [2] : vector<2x8x8xf32> to vector<2x8xf32>
    %110 = vector.shape_cast %109 : vector<2x8xf32> to vector<2x8x1xf32>
    %111 = vector.broadcast %110 : vector<2x8x1xf32> to vector<2x8x8xf32>
    %112 = arith.subf %108, %111 : vector<2x8x8xf32>
    %113 = math.exp %112 : vector<2x8x8xf32>
    %cst_41 = arith.constant dense<0.000000e+00> : vector<2x8xf32>
    %114 = vector.multi_reduction <add>, %113, %cst_41 [2] : vector<2x8x8xf32> to vector<2x8xf32>
    %115 = vector.shape_cast %114 : vector<2x8xf32> to vector<2x8x1xf32>
    %116 = tpu.reciprocal %115 : vector<2x8x1xf32> -> vector<2x8x1xf32>
    %117 = vector.broadcast %116 : vector<2x8x1xf32> to vector<2x8x8xf32>
    %118 = arith.mulf %113, %117 : vector<2x8x8xf32>
    %119 = arith.truncf %118 : vector<2x8x8xf32> to vector<2x8x8xbf16>
    %120 = vector.extract_strided_slice %34 {offsets = [0, 0, 24], sizes = [2, 8, 8], strides = [1, 1, 1]} : vector<2x8x32xf32> to vector<2x8x8xf32>
    %121 = arith.truncf %120 : vector<2x8x8xf32> to vector<2x8x8xbf16>
    "tpu.trace_start"() <{level = 10 : i32, message = "bqk,bkd->bqd"}> : () -> ()
    %cst_42 = arith.constant dense<0.000000e+00> : vector<2x8x8xf32>
    %122 = tpu.matmul %119, %121, %cst_42 {dimension_numbers = #tpu.dot_dimension_numbers<[2], [1], [1], [2], [0, 0, 0, 1, 1, 2], [0], [0]>} : vector<2x8x8xbf16>, vector<2x8x8xbf16>, vector<2x8x8xf32> -> vector<2x8x8xf32>
    "tpu.trace_stop"() : () -> ()
    %123 = arith.truncf %122 : vector<2x8x8xf32> to vector<2x8x8xbf16>
    %124 = tpu.concatenate %57, %79, %101, %123 in 2 : vector<2x8x8xbf16>, vector<2x8x8xbf16>, vector<2x8x8xbf16>, vector<2x8x8xbf16> -> vector<2x8x32xbf16>
    %125 = vector.shape_cast %124 : vector<2x8x32xbf16> to vector<16x32xbf16>
    %c0_43 = arith.constant 0 : index
    %c0_44 = arith.constant 0 : index
    %c0_45 = arith.constant 0 : index
    %126 = vector.load %arg5[%c0_43, %c0_44, %c0_45] : memref<1x32x32xbf16, #tpu.memory_space<vmem>>, vector<1x32x32xbf16>
    %127 = vector.shape_cast %126 : vector<1x32x32xbf16> to vector<32x32xbf16>
    %cst_46 = arith.constant dense<0.000000e+00> : vector<16x32xf32>
    %128 = tpu.matmul %125, %127, %cst_46 {dimension_numbers = #tpu.dot_dimension_numbers<[1], [0], [0], [1], [0, 0, 1, 1], [], []>} : vector<16x32xbf16>, vector<32x32xbf16>, vector<16x32xf32> -> vector<16x32xf32>
    %129 = vector.broadcast %8 : vector<1x32xf32> to vector<16x32xf32>
    %130 = arith.addf %128, %129 : vector<16x32xf32>
    %131 = arith.addf %4, %130 : vector<16x32xf32>
    %cst_47 = arith.constant dense<0.000000e+00> : vector<16xf32>
    %132 = vector.multi_reduction <add>, %131, %cst_47 [1] : vector<16x32xf32> to vector<16xf32>
    %133 = vector.shape_cast %132 : vector<16xf32> to vector<16x1xf32>
    %cst_48 = arith.constant 3.200000e+01 : f32
    %134 = vector.broadcast %cst_48 : f32 to vector<16x1xf32>
    %135 = arith.divf %133, %134 : vector<16x1xf32>
    %136 = vector.broadcast %135 : vector<16x1xf32> to vector<16x32xf32>
    %137 = arith.subf %131, %136 : vector<16x32xf32>
    %138 = arith.mulf %137, %137 : vector<16x32xf32>
    %cst_49 = arith.constant dense<0.000000e+00> : vector<16xf32>
    %139 = vector.multi_reduction <add>, %138, %cst_49 [1] : vector<16x32xf32> to vector<16xf32>
    %140 = vector.shape_cast %139 : vector<16xf32> to vector<16x1xf32>
    %cst_50 = arith.constant 3.200000e+01 : f32
    %141 = vector.broadcast %cst_50 : f32 to vector<16x1xf32>
    %142 = arith.divf %140, %141 : vector<16x1xf32>
    %143 = vector.broadcast %135 : vector<16x1xf32> to vector<16x32xf32>
    %144 = arith.subf %131, %143 : vector<16x32xf32>
    %cst_51 = arith.constant 9.99999974E-6 : f32
    %145 = vector.broadcast %cst_51 : f32 to vector<16x1xf32>
    %146 = arith.addf %142, %145 : vector<16x1xf32>
    %147 = math.rsqrt %146 : vector<16x1xf32>
    %148 = vector.broadcast %147 : vector<16x1xf32> to vector<16x32xf32>
    %149 = arith.mulf %144, %148 : vector<16x32xf32>
    %150 = vector.broadcast %10 : vector<1x32xf32> to vector<16x32xf32>
    %151 = arith.mulf %149, %150 : vector<16x32xf32>
    %152 = vector.broadcast %12 : vector<1x32xf32> to vector<16x32xf32>
    %153 = arith.addf %151, %152 : vector<16x32xf32>
    %154 = arith.truncf %153 : vector<16x32xf32> to vector<16x32xbf16>
    %c0_52 = arith.constant 0 : index
    %c0_53 = arith.constant 0 : index
    %c0_54 = arith.constant 0 : index
    %155 = vector.load %arg6[%c0_52, %c0_53, %c0_54] : memref<1x32x64xbf16, #tpu.memory_space<vmem>>, vector<1x32x64xbf16>
    %156 = vector.shape_cast %155 : vector<1x32x64xbf16> to vector<32x64xbf16>
    %cst_55 = arith.constant dense<0.000000e+00> : vector<16x64xf32>
    %157 = tpu.matmul %154, %156, %cst_55 {dimension_numbers = #tpu.dot_dimension_numbers<[1], [0], [0], [1], [0, 0, 1, 1], [], []>} : vector<16x32xbf16>, vector<32x64xbf16>, vector<16x64xf32> -> vector<16x64xf32>
    %158 = vector.broadcast %14 : vector<1x64xf32> to vector<16x64xf32>
    %159 = arith.addf %157, %158 : vector<16x64xf32>
    %cst_56 = arith.constant 5.000000e-01 : f32
    %160 = vector.broadcast %cst_56 : f32 to vector<16x64xf32>
    %161 = arith.mulf %160, %159 : vector<16x64xf32>
    %cst_57 = arith.constant 4.471500e-02 : f32
    %162 = vector.broadcast %cst_57 : f32 to vector<16x64xf32>
    %163 = arith.mulf %162, %159 : vector<16x64xf32>
    %164 = arith.mulf %163, %159 : vector<16x64xf32>
    %165 = arith.mulf %164, %159 : vector<16x64xf32>
    %166 = arith.addf %159, %165 : vector<16x64xf32>
    %cst_58 = arith.constant 0.797884583 : f32
    %167 = vector.broadcast %cst_58 : f32 to vector<16x64xf32>
    %168 = arith.mulf %167, %166 : vector<16x64xf32>
    %169 = math.tanh %168 : vector<16x64xf32>
    %cst_59 = arith.constant 1.000000e+00 : f32
    %170 = vector.broadcast %cst_59 : f32 to vector<16x64xf32>
    %171 = arith.addf %170, %169 : vector<16x64xf32>
    %172 = arith.mulf %161, %171 : vector<16x64xf32>
    %173 = arith.truncf %172 : vector<16x64xf32> to vector<16x64xbf16>
    %c0_60 = arith.constant 0 : index
    %c0_61 = arith.constant 0 : index
    %c0_62 = arith.constant 0 : index
    %174 = vector.load %arg7[%c0_60, %c0_61, %c0_62] : memref<1x64x32xbf16, #tpu.memory_space<vmem>>, vector<1x64x32xbf16>
    %175 = vector.shape_cast %174 : vector<1x64x32xbf16> to vector<64x32xbf16>
    %cst_63 = arith.constant dense<0.000000e+00> : vector<16x32xf32>
    %176 = tpu.matmul %173, %175, %cst_63 {dimension_numbers = #tpu.dot_dimension_numbers<[1], [0], [0], [1], [0, 0, 1, 1], [], []>} : vector<16x64xbf16>, vector<64x32xbf16>, vector<16x32xf32> -> vector<16x32xf32>
    %177 = vector.broadcast %16 : vector<1x32xf32> to vector<16x32xf32>
    %178 = arith.addf %176, %177 : vector<16x32xf32>
    %179 = arith.addf %153, %178 : vector<16x32xf32>
    %cst_64 = arith.constant dense<0.000000e+00> : vector<16xf32>
    %180 = vector.multi_reduction <add>, %179, %cst_64 [1] : vector<16x32xf32> to vector<16xf32>
    %181 = vector.shape_cast %180 : vector<16xf32> to vector<16x1xf32>
    %cst_65 = arith.constant 3.200000e+01 : f32
    %182 = vector.broadcast %cst_65 : f32 to vector<16x1xf32>
    %183 = arith.divf %181, %182 : vector<16x1xf32>
    %184 = vector.broadcast %183 : vector<16x1xf32> to vector<16x32xf32>
    %185 = arith.subf %179, %184 : vector<16x32xf32>
    %186 = arith.mulf %185, %185 : vector<16x32xf32>
    %cst_66 = arith.constant dense<0.000000e+00> : vector<16xf32>
    %187 = vector.multi_reduction <add>, %186, %cst_66 [1] : vector<16x32xf32> to vector<16xf32>
    %188 = vector.shape_cast %187 : vector<16xf32> to vector<16x1xf32>
    %cst_67 = arith.constant 3.200000e+01 : f32
    %189 = vector.broadcast %cst_67 : f32 to vector<16x1xf32>
    %190 = arith.divf %188, %189 : vector<16x1xf32>
    %191 = vector.broadcast %183 : vector<16x1xf32> to vector<16x32xf32>
    %192 = arith.subf %179, %191 : vector<16x32xf32>
    %cst_68 = arith.constant 9.99999974E-6 : f32
    %193 = vector.broadcast %cst_68 : f32 to vector<16x1xf32>
    %194 = arith.addf %190, %193 : vector<16x1xf32>
    %195 = math.rsqrt %194 : vector<16x1xf32>
    %196 = vector.broadcast %195 : vector<16x1xf32> to vector<16x32xf32>
    %197 = arith.mulf %192, %196 : vector<16x32xf32>
    %198 = vector.broadcast %18 : vector<1x32xf32> to vector<16x32xf32>
    %199 = arith.mulf %197, %198 : vector<16x32xf32>
    %200 = vector.broadcast %20 : vector<1x32xf32> to vector<16x32xf32>
    %201 = arith.addf %199, %200 : vector<16x32xf32>
    %202 = vector.shape_cast %201 : vector<16x32xf32> to vector<2x8x32xf32>
    %c0_69 = arith.constant 0 : index
    %c0_70 = arith.constant 0 : index
    %c0_71 = arith.constant 0 : index
    %203 = vector.load %arg9[%c0_69, %c0_70, %c0_71] : memref<2x8x32xf32, #tpu.memory_space<vmem>>, vector<2x8x32xf32>
    tpu.vector_store %arg9[%c0_69, %c0_70, %c0_71], %202 {strides = array<i32>} : memref<2x8x32xf32, #tpu.memory_space<vmem>>, vector<2x8x32xf32>,
    return
  }
  func.func @transform_0(%arg0: i32, %arg1: i32) -> (i32, i32, i32) {
    %c0_i32 = arith.constant 0 : i32
    %c0_i32_0 = arith.constant 0 : i32
    %c0_i32_1 = arith.constant 0 : i32
    return %arg0, %c0_i32, %c0_i32_0 : i32, i32, i32
  }
  func.func @transform_1(%arg0: i32, %arg1: i32) -> (i32, i32, i32) {
    %c0_i32 = arith.constant 0 : i32
    %c0_i32_0 = arith.constant 0 : i32
    %c0_i32_1 = arith.constant 0 : i32
    return %arg0, %c0_i32, %c0_i32_0 : i32, i32, i32
  }
  func.func @transform_2(%arg0: i32, %arg1: i32) -> (i32, i32, i32) {
    %c0_i32 = arith.constant 0 : i32
    %c0_i32_0 = arith.constant 0 : i32
    %c0_i32_1 = arith.constant 0 : i32
    return %arg1, %c0_i32, %c0_i32_0 : i32, i32, i32
  }
  func.func @transform_3(%arg0: i32, %arg1: i32) -> (i32, i32, i32) {
    %c0_i32 = arith.constant 0 : i32
    %c0_i32_0 = arith.constant 0 : i32
    %c0_i32_1 = arith.constant 0 : i32
    return %arg1, %c0_i32, %c0_i32_0 : i32, i32, i32
  }
  func.func @transform_4(%arg0: i32, %arg1: i32) -> (i32, i32, i32) {
    %c0_i32 = arith.constant 0 : i32
    %c0_i32_0 = arith.constant 0 : i32
    %c0_i32_1 = arith.constant 0 : i32
    return %arg1, %c0_i32, %c0_i32_0 : i32, i32, i32
  }
  func.func @transform_5(%arg0: i32, %arg1: i32) -> (i32, i32, i32) {
    %c0_i32 = arith.constant 0 : i32
    %c0_i32_0 = arith.constant 0 : i32
    %c0_i32_1 = arith.constant 0 : i32
    return %arg1, %c0_i32, %c0_i32_0 : i32, i32, i32
  }
  func.func @transform_6(%arg0: i32, %arg1: i32) -> (i32, i32, i32) {
    %c0_i32 = arith.constant 0 : i32
    %c0_i32_0 = arith.constant 0 : i32
    %c0_i32_1 = arith.constant 0 : i32
    return %arg1, %c0_i32, %c0_i32_0 : i32, i32, i32
  }
  func.func @transform_7(%arg0: i32, %arg1: i32) -> (i32, i32, i32) {
    %c0_i32 = arith.constant 0 : i32
    %c0_i32_0 = arith.constant 0 : i32
    %c0_i32_1 = arith.constant 0 : i32
    return %arg0, %c0_i32, %c0_i32_0 : i32, i32, i32
  }
}

</mosaic_0001>

<bundles_post_ra>
// kernel: nlp_transformer_forward.3
= control target key start
LH: loop header
LB: loop body
LE: loop exit
PB: predicated region body
PF: predicated region fallthrough
CT: control target
= control target key end

     0   :  { %v149_v1 = vmov 0.0   ;;  %vm150_vm0 = vmmov 0   ;;  %s192_s0 = inlined_call_operand.vmem [shape: f32[16,32], index: 0, kind: input, shape index: {}]   ;;  %s193_s1 = inlined_call_operand.vmem [shape: bf16[32,128], index: 1, kind: input, shape index: {}]   ;;  %s194_s2 = inlined_call_operand.vmem [shape: f32[1,128], index: 2, kind: input, shape index: {}]   ;;  %s195_s3 = inlined_call_operand.hbm [shape: f32[16,128], index: 3, kind: output, shape index: {}]  }
   0x1   :  { %v125_v0 = vld [vmem:[%s193_s1 + $0x8] sm:$0xff]   ;;  %112 = vmatprep.subr.bf16.mxu0 %v149_v1  ;;  %v126_v2 = vld [vmem:[%s193_s1] sm:$0xff]   ;;  %116 = vmatprep.mubr.msk.bf16.mxu0 %vm150_vm0, %v149_v1 }
   0x2   :  { %113 = vmatpush3.bf16.msra.mxu0 %v125_v0  ;;  %v16_v3 = vld [vmem:[%s192_s0] sm:$0xff]  ;;  %v17_v4 = vld [vmem:[%s192_s0 + $0x8] sm:$0xff] }
   0x3   :  { %114 = vmatprep.subr.bf16.mxu0 %v149_v1 }
   0x4   :  { %8 = vsyncpa [#allocation3], 0  ;;  %v18_v5 = vpack.c.bf16 %v17_v4, %v16_v3  ;;  %vm42_vm1 = vcmask 261120   ;;  %v105_v6 = vld [vmem:[%s194_s2] ss:$0 sm:$0xff]  ;;  %s151_s1 = smov [#allocation2]  }
   0x5   :  { %s94_s22 = sshll.u32 %s151_s1, 4  ;;  %s95_s22 = int_to_ptr.vmem [resolvable:$true] %s94_s22 }
   0x6   :  { %115 = vmatpush3.bf16.msra.mxu0 %v126_v2  ;;  %s127_s0 = scalar_lea.vmem %s95_s22, 256  ;;  %p132_p1 = scmp.lt.s32.totalorder %s95_s22, %s95_s22 }
   0x7   :  { %p128_p0 = scmp.ne.s32.totalorder %s95_s22, %s127_s0  ;;  %p133_p2 = scmp.lt.s32.totalorder %s127_s0, %s127_s0 }
   0x9   :  { %117 = vmatmul.mubr.msk.bf16.vlgmr.msra.gmra.mxu0 %vm42_vm1, %v18_v5  ;;  %p134_p3 = por %p133_p2, %p132_p1 }
   0xb   :  { %p135_p4 = pnand %p134_p3, %p128_p0 }
  0xc9   :  { %v80_v7 = vpop.f32.mrf.mxu0 }
  0xca   :  { %v81_v8 = vadd.f32 %v105_v6, %v80_v7 }
  0xcb   :  { %v118_v9 = vpop.f32.mrf.mxu0 }
  0xcc   :  { %87 = vst [vmem:[#allocation2] sm:$0xff] %v81_v8 }
  0xcd   :  { %v83_v10 = vpop.f32.mrf.mxu0 }
  0xce   :  { %v84_v11 = vadd.f32 %v105_v6, %v83_v10 }
  0xcf   :  { %v119_v12 = vpop.f32.mrf.mxu0 }
  0xd0   :  { %88 = vst [vmem:[#allocation2 + $0x8] sm:$0xff] %v84_v11 }
  0xd1   :  { %138 = shalt.err (!%p135_p4)
}
  0xd2   :  { %s152_s23 = smov 128   ;;  %s153_s2 = smov 8  }
  0xd3   :  { %100 = dma.vmem_to_hbm [thread:$0]  %s95_s22, 256, %s195_s3, [#allocation3], %s152_s23, %s152_s23, %s153_s2  }
  0xd4   :  { %147 = dma.done.wait [#allocation3], 256  }
  0xd5   :  { %148 = vsyncadd [#allocation3], 4294967040 }
  0xd6   :  { %104 = vsyncpa [#allocation3], 1 }

// kernel: nlp_transformer_forward.2
= control target key start
LH: loop header
LB: loop body
LE: loop exit
PB: predicated region body
PF: predicated region fallthrough
CT: control target
= control target key end

     0   :  { %s2304_s24 = smov 0   ;;  %s2306_s25 = smov 0   ;;  %s2605_s0 = inlined_call_operand.vmem [shape: f32[2,8,32], index: 0, kind: input, shape index: {}, may-alias: {0,7}]   ;;  %s2606_s1 = inlined_call_operand.vmem [shape: f32[2,1,8], index: 1, kind: input, shape index: {}]   ;;  %s2607_s2 = inlined_call_operand.vmem [shape: bf16[2,32,96], index: 2, kind: input, shape index: {}]   ;;  %s2608_s3 = inlined_call_operand.vmem [shape: bf16[2,32,32], index: 3, kind: input, shape index: {}]   ;;  %s2609_s4 = inlined_call_operand.vmem [shape: bf16[2,32,64], index: 4, kind: input, shape index: {}]   ;;  %s2610_s5 = inlined_call_operand.vmem [shape: bf16[2,64,32], index: 5, kind: input, shape index: {}]   ;;  %s2611_s6 = inlined_call_operand.vmem [shape: f32[2,1,352], index: 6, kind: input, shape index: {}]   ;;  %s2612_s7 = inlined_call_operand.vmem [shape: f32[2,8,32], index: 7, kind: output, shape index: {}, may-alias: {0,7}]  }
   0x1   :  { %s2308_s26 = smov 0  }
   0x2 LB: > { %s26_s27 = sadd.s32 1, %s2241_s25  ;;  %p1895_p0 = scmp.ge.s32.totalorder %s2245_s26, 1  ;;  %s2245_s26 = sphi %s2308_s26, %s17_s26   ;;  %s2241_s25 = sphi %s2306_s25, %s2614_s25   ;;  %s2237_s24 = sphi %s2304_s24, %s2613_s24  }
   0x3   : > { %p27_p1 = scmp.ge.s32.totalorder %s26_s27, 2  ;;  %p309_p2 = scmp.lt.s32.totalorder %s2245_s26, 3 }
   0x5   : > { %s2616_s27 = smov (%p27_p1, %s26_s27), 0  ;;  %p310_p3 = pnand %p1895_p0, %p309_p2 }
   0x6   : > { %p380_p4 = scmp.lt.s32.totalorder (!%p310_p3), %s2237_s24, 1  ;;  %p1904_p5 = scmp.ne.s32.totalorder (!%p310_p3), %s2237_s24, 0 }
   0x7   : > { %313 = sbr.rel (%p310_p3) target bundleno = 3981 (0xf8d), region = 48 }
   0xc   : > { %s381_s28 = scalar_select %p380_p4, %s2237_s24, 1 }
   0xe   : > { %s1945_s29 = sshll.u32 %s381_s28, 4  ;;  %s1948_s30 = sshll.u32 %s381_s28, 5 }
   0xf   : > { %s384_s10 = scalar_lea.vmem %s2607_s2, %s1945_s29  ;;  %s2328_s13 = scalar_lea.vmem %s2608_s3, %s1945_s29 }
  0x10   : > { %s2333_s16 = scalar_lea.vmem %s2609_s4, %s1945_s29  ;;  %s2338_s19 = scalar_lea.vmem %s2610_s5, %s1948_s30 }
  0x11   : > { %s2127_s20 = smul.u32 3, %s381_s28 }
  0x12   : > { %414 = sbr.rel (%p1904_p5) target bundleno = 25 (0x19), region = 52 }
  0x13   : > { %s2343_s23 = scalar_lea.vmem %s2611_s6, %s2127_s20 }
  0x17   : > { %v415_v0 = vld [vmem:[%s2605_s0] sm:$0xff]  ;;  %vm417_vm0 = vcmask 261120   ;;  %v416_v1 = vld [vmem:[%s2605_s0 + $0x8] sm:$0xff] }
  0x18   : > { %418 = vst.msk [vmem:[%s2612_s7] sm:$0xff] %vm417_vm0, %v415_v0  ;;  %419 = vst.msk [vmem:[%s2612_s7 + $0x8] sm:$0xff] %vm417_vm0, %v416_v1 }
  0x19 PF: > { %v2169_v2 = vld [vmem:[%s384_s10 + $0x8] sm:$0xff]   ;;  %v2247_v3 = vmov 0.0   ;;  %v2170_v4 = vld [vmem:[%s384_s10] sm:$0xff]   ;;  %vm2248_vm1 = vmmov 0   ;;  %vm448_vm2 = vcmask 261120   ;;  %s2249_s10 = smov 96  }
  0x1a   : > { %1995 = vmatprep.subr.bf16.mxu0 %v2247_v3  ;;  %2003 = vmatprep.subr.bf16.mxu1 %v2247_v3  ;;  %v2381_v8 = vld [vmem:[%s2343_s23] ss:$0 sm:$0xff]  ;;  %vm516_vm3 = vcmask 64512   ;;  %v2418_v29 = vld [vmem:[%s2606_s1 + $0x1] ss:$0 sm:$0xff]  ;;  %s2250_s9 = smov 64  }
  0x1b   : > { %1996 = vmatpush3.bf16.msra.mxu0 %v2169_v2  ;;  %1999 = vmatprep.mubr.msk.bf16.mxu0 %vm2248_vm1, %v2247_v3  ;;  %v2412_v25 = vld [vmem:[%s2606_s1] ss:$0 sm:$0xff]  ;;  %s2251_s29 = smov 88   ;;  %vm641_vm4 = vcmask 1043456   ;;  %s2252_s11 = smov 120   ;;  %vm1427_vm5 = vcmask 130048  }
  0x1c   : > { %1997 = vmatprep.subr.bf16.mxu0 %v2247_v3  ;;  %2005 = vmatprep.mubr.msk.bf16.mxu1 %vm2248_vm1, %v2247_v3  ;;  %s2253_s12 = smov 56   ;;  %s2254_s30 = smov 80   ;;  %vm1432_vm6 = vcmask 195584   ;;  %vm1668_vm7 = vcmask 523264  }
  0x1d   : > { %s2255_s28 = smov 112   ;;  %s2256_s14 = smov 48  }
  0x1e   : > { %s2257_s24 = smov 72   ;;  %s2258_s15 = smov 104  }
  0x1f   : > { %v2364_v5 = vld [vmem:[%s2612_s7] sm:$0xff]  ;;  %v2369_v6 = vld [vmem:[%s2612_s7 + $0x8] sm:$0xff]  ;;  %1998 = vmatpush3.bf16.msra.mxu0 %v2170_v4  ;;  %s2259_s17 = smov 40   ;;  %s2260_s18 = smov 8  }
  0x20   : > { %v425_v7 = vpack.c.bf16 %v2369_v6, %v2364_v5  ;;  %2009 = vmatprep.subr.bf16.mxu0 %v2247_v3  ;;  %s2261_s20 = smov 16   ;;  %s2262_s21 = smov 24  }
  0x21   : > { %s2263_s22 = smov 32  }
  0x22   : > { %2000 = vmatmul.mubr.msk.bf16.vlgmr.msra.gmra.mxu0 %vm448_vm2, %v425_v7 }
  0x23   : > { %2011 = vmatprep.mubr.msk.bf16.mxu0 %vm2248_vm1, %v2247_v3 }
  0xe2   : > { %v486_v9 = vpop.f32.mrf.mxu0 }
  0xe3   : > { %v487_v10 = vadd.f32 %v2381_v8, %v486_v9 }
  0xe4   : > { %v2001_v11 = vpop.f32.mrf.mxu0 }
  0xe5   : > { %v2384_v12 = vpack.c.bf16 %v487_v10, %v487_v10  ;;  %v493_v19 = vmul.f32 0.35355338, %v487_v10 }
  0xe6   : > { %v489_v13 = vpop.f32.mrf.mxu0 }
  0xe7   : > { %v490_v14 = vadd.f32 %v2381_v8, %v489_v13  ;;  %514 = vrot.lane.b32.xlu0 %v2384_v12, %s2249_s10  ;;  %v2396_v22 = vpack.c.bf16 %v493_v19, %v493_v19 }
  0xe8   : > { %v2002_v15 = vpop.f32.mrf.mxu0 }
  0xe9   : > { %v2389_v16 = vpack.c.bf16 %v490_v14, %v490_v14  ;;  %v494_v23 = vmul.f32 0.35355338, %v490_v14 }
  0xeb   : > { %564 = vrot.lane.b32.xlu0 %v2389_v16, %s2249_s10  ;;  %v2403_v24 = vpack.c.bf16 %v494_v23, %v494_v23 }
 0x159   : > { %v515_v17 = vpop.permute.xlu0 %514 }
 0x15a   : > { %v521_v18 = vsel %vm516_vm3, %v515_v17, 0 }
 0x15b   : > { %2004 = vmatpush3.bf16.xpose.msra.mxu1 %v521_v18 }
 0x15c   : > { %2015 = vmatprep.subr.bf16.mxu1 %v2247_v3 }
 0x15d   : > { %v565_v20 = vpop.permute.xlu0 %564 }
 0x15e   : > { %v570_v21 = vsel %vm516_vm3, %v565_v20, 0 }
 0x15f   : > { %2010 = vmatpush3.bf16.xpose.msra.mxu0 %v570_v21 }
 0x160   : > { %2021 = vmatprep.subr.bf16.mxu0 %v2247_v3 }
 0x162   : > { %2006 = vmatmul.mubr.msk.bf16.vlgmr.msra.gmra.mxu1 %vm516_vm3, %v2396_v22 }
 0x163   : > { %2017 = vmatprep.mubr.msk.bf16.mxu1 %vm2248_vm1, %v2247_v3 }
 0x166   : > { %2012 = vmatmul.mubr.msk.bf16.vlgmr.msra.gmra.mxu0 %vm516_vm3, %v2403_v24 }
 0x167   : > { %2023 = vmatprep.mubr.msk.bf16.mxu0 %vm2248_vm1, %v2247_v3 }
 0x222   : > { %v557_v26 = vpop.f32.mrf.mxu1 }
 0x223   : > { %v558_v27 = vadd.f32 %v2412_v25, %v557_v26 }
 0x224   : > { %v2007_v28 = vpop.f32.mrf.mxu1 }
 0x225   : > { %v612_v30 = vsel %vm516_vm3, %v558_v27, -inf }
 0x226   : > { %613 = vmax.xlane.f32.xlu1 %v612_v30  ;;  %v560_v31 = vpop.f32.mrf.mxu1  ;;  %v606_v32 = vpop.f32.mrf.mxu0 }
 0x227   : > { %v607_v33 = vadd.f32 %v2418_v29, %v606_v32 }
 0x228   : > { %v2008_v34 = vpop.f32.mrf.mxu1  ;;  %v2013_v35 = vpop.f32.mrf.mxu0 }
 0x229   : > { %v615_v36 = vsel %vm516_vm3, %v607_v33, -inf }
 0x22a   : > { %616 = vmax.xlane.f32.xlu1 %v615_v36  ;;  %v609_v37 = vpop.f32.mrf.mxu0 }
 0x22c   : > { %v2014_v38 = vpop.f32.mrf.mxu0 }
 0x23b   : > { %636 = vrot.lane.b32.xlu1 %v2384_v12, %s2250_s9 }
 0x23f   : > { %685 = vrot.lane.b32.xlu1 %v2389_v16, %s2250_s9 }
 0x243   : > { %738 = vrot.lane.b32.xlu1 %v2384_v12, %s2251_s29 }
 0x2af   : > { %v614_v39 = vpop.xlane.xlu1 %613 }
 0x2b0   : > { %v618_v40 = vsub.f32 %v558_v27, %v614_v39 }
 0x2b2   : > { %v620_v41 = vmul.f32 1.442695, %v618_v40 }
 0x2b3   : > { %v617_v42 = vpop.xlane.xlu1 %616 }
 0x2b4   : > { %2179 = vpow2.f32 %v620_v41  ;;  %v619_v43 = vsub.f32 %v607_v33, %v617_v42 }
 0x2b6   : > { %v622_v44 = vmul.f32 1.442695, %v619_v43 }
 0x2b7   : > { %v637_v45 = vpop.permute.xlu1 %636 }
 0x2b8   : > { %2181 = vpow2.f32 %v622_v44  ;;  %v643_v46 = vsel %vm641_vm4, %v637_v45, 0 }
 0x2b9   : > { %2016 = vmatpush3.bf16.msra.mxu1 %v643_v46 }
 0x2ba   : > { %2027 = vmatprep.subr.bf16.mxu1 %v2247_v3 }
 0x2bb   : > { %v686_v47 = vpop.permute.xlu1 %685 }
 0x2bc   : > { %v691_v48 = vsel %vm641_vm4, %v686_v47, 0 }
 0x2bd   : > { %2022 = vmatpush3.bf16.msra.mxu0 %v691_v48 }
 0x2be   : > { %2033 = vmatprep.subr.bf16.mxu0 %v2247_v3 }
 0x2bf   : > { %v739_v53 = vpop.permute.xlu1 %738 }
 0x2c0   : > { %v744_v60 = vsel %vm516_vm3, %v739_v53, 0 }
 0x2c1   : > { %v2180_v49 = vpop.eup %2179 }
 0x2c2   : > { %v624_v50 = vsel %vm516_vm3, %v2180_v49, 0.0 }
 0x2c3   : > { %625 = vadd.xlane.f32.xlu0 %v624_v50 }
 0x2c5   : > { %v2182_v51 = vpop.eup %2181 }
 0x2c6   : > { %v627_v52 = vsel %vm516_vm3, %v2182_v51, 0.0 }
 0x2c7   : > { %628 = vadd.xlane.f32.xlu1 %v627_v52 }
 0x2d8   : > { %789 = vrot.lane.b32.xlu1 %v2389_v16, %s2251_s29 }
 0x2d9   : > { %736 = vrot.lane.b32.xlu0 %v2396_v22, %s2252_s11 }
 0x2dc   : > { %787 = vrot.lane.b32.xlu1 %v2403_v24, %s2252_s11 }
 0x34c   : > { %v626_v54 = vpop.xlane.xlu0 %625 }
 0x34d   : > { %2183 = vrcp.f32 %v626_v54 }
 0x350   : > { %v629_v55 = vpop.xlane.xlu1 %628  ;;  %v737_v1 = vpop.permute.xlu0 %736 }
 0x351   : > { %2185 = vrcp.f32 %v629_v55 }
 0x354   : > { %v790_v62 = vpop.permute.xlu1 %789 }
 0x355   : > { %v795_v0 = vsel %vm516_vm3, %v790_v62, 0 }
 0x358   : > { %v788_v2 = vpop.permute.xlu1 %787 }
 0x35a   : > { %v2184_v56 = vpop.eup %2183 }
 0x35b   : > { %v632_v57 = vmul.f32 %v2184_v56, %v2180_v49 }
 0x35d   : > { %v634_v58 = vpack.c.bf16 %v632_v57, %v632_v57 }
 0x35e   : > { %v2186_v59 = vpop.eup %2185 }
 0x35f   : > { %2018 = vmatmul.mubr.msk.bf16.vlgmr.msra.gmra.mxu1 %vm516_vm3, %v634_v58  ;;  %v633_v61 = vmul.f32 %v2186_v59, %v2182_v51 }
 0x360   : > { %2028 = vmatpush3.bf16.xpose.msra.mxu1 %v744_v60  ;;  %2029 = vmatprep.mubr.msk.bf16.mxu1 %vm2248_vm1, %v2247_v3 }
 0x361   : > { %v635_v63 = vpack.c.bf16 %v633_v61, %v633_v61  ;;  %2039 = vmatprep.subr.bf16.mxu1 %v2247_v3 }
 0x363   : > { %2024 = vmatmul.mubr.msk.bf16.vlgmr.msra.gmra.mxu0 %vm516_vm3, %v635_v63 }
 0x364   : > { %2034 = vmatpush3.bf16.xpose.msra.mxu0 %v795_v0  ;;  %2035 = vmatprep.mubr.msk.bf16.mxu0 %vm2248_vm1, %v2247_v3 }
 0x365   : > { %2045 = vmatprep.subr.bf16.mxu0 %v2247_v3 }
 0x367   : > { %2030 = vmatmul.mubr.msk.bf16.vlgmr.msra.gmra.mxu1 %vm516_vm3, %v737_v1 }
 0x368   : > { %2041 = vmatprep.mubr.msk.bf16.mxu1 %vm2248_vm1, %v2247_v3 }
 0x36b   : > { %2036 = vmatmul.mubr.msk.bf16.vlgmr.msra.gmra.mxu0 %vm516_vm3, %v788_v2 }
 0x36c   : > { %2047 = vmatprep.mubr.msk.bf16.mxu0 %vm2248_vm1, %v2247_v3 }
 0x41f   : > { %v2453_v4 = vpop.f32.mrf.mxu1 }
 0x421   : > { %v2019_v7 = vpop.f32.mrf.mxu1 }
 0x423   : > { %v682_v9 = vpop.f32.mrf.mxu1  ;;  %v2455_v10 = vpop.f32.mrf.mxu0 }
 0x425   : > { %v2020_v11 = vpop.f32.mrf.mxu1  ;;  %v2025_v13 = vpop.f32.mrf.mxu0 }
 0x427   : > { %v730_v14 = vpop.f32.mrf.mxu0  ;;  %v780_v15 = vpop.f32.mrf.mxu1 }
 0x428   : > { %v781_v17 = vadd.f32 %v2412_v25, %v780_v15 }
 0x429   : > { %v2026_v18 = vpop.f32.mrf.mxu0  ;;  %v2031_v19 = vpop.f32.mrf.mxu1 }
 0x42a   : > { %v837_v20 = vsel %vm516_vm3, %v781_v17, -inf }
 0x42b   : > { %838 = vmax.xlane.f32.xlu1 %v837_v20  ;;  %v783_v21 = vpop.f32.mrf.mxu1  ;;  %v831_v23 = vpop.f32.mrf.mxu0 }
 0x42c   : > { %v832_v26 = vadd.f32 %v2418_v29, %v831_v23 }
 0x42d   : > { %v2032_v27 = vpop.f32.mrf.mxu1  ;;  %v2037_v28 = vpop.f32.mrf.mxu0 }
 0x42e   : > { %v840_v30 = vsel %vm516_vm3, %v832_v26, -inf }
 0x42f   : > { %841 = vmax.xlane.f32.xlu0 %v840_v30  ;;  %v834_v31 = vpop.f32.mrf.mxu0 }
 0x431   : > { %v2038_v32 = vpop.f32.mrf.mxu0 }
 0x43c   : > { %861 = vrot.lane.b32.xlu1 %v2384_v12, %s2253_s12 }
 0x440   : > { %961 = vrot.lane.b32.xlu1 %v2384_v12, %s2254_s30 }
 0x445   : > { %909 = vrot.lane.b32.xlu0 %v2389_v16, %s2253_s12 }
 0x449   : > { %959 = vrot.lane.b32.xlu0 %v2396_v22, %s2255_s28 }
 0x4b4   : > { %v839_v33 = vpop.xlane.xlu1 %838 }
 0x4b5   : > { %v843_v34 = vsub.f32 %v781_v17, %v839_v33 }
 0x4b7   : > { %v845_v35 = vmul.f32 1.442695, %v843_v34 }
 0x4b8   : > { %v862_v36 = vpop.permute.xlu1 %861  ;;  %v842_v37 = vpop.xlane.xlu0 %841 }
 0x4b9   : > { %2187 = vpow2.f32 %v845_v35  ;;  %v867_v38 = vsel %vm641_vm4, %v862_v36, 0  ;;  %v844_v39 = vsub.f32 %v832_v26, %v842_v37 }
 0x4ba   : > { %2040 = vmatpush3.bf16.msra.mxu1 %v867_v38 }
 0x4bb   : > { %v847_v40 = vmul.f32 1.442695, %v844_v39  ;;  %2051 = vmatprep.subr.bf16.mxu1 %v2247_v3 }
 0x4bc   : > { %v910_v41 = vpop.permute.xlu0 %909  ;;  %v962_v47 = vpop.permute.xlu1 %961 }
 0x4bd   : > { %2189 = vpow2.f32 %v847_v40  ;;  %v915_v42 = vsel %vm641_vm4, %v910_v41, 0  ;;  %v967_v54 = vsel %vm516_vm3, %v962_v47, 0 }
 0x4be   : > { %2046 = vmatpush3.bf16.msra.mxu0 %v915_v42 }
 0x4bf   : > { %2057 = vmatprep.subr.bf16.mxu0 %v2247_v3 }
 0x4c0   : > { %v960_v59 = vpop.permute.xlu0 %959 }
 0x4c6   : > { %v2188_v43 = vpop.eup %2187 }
 0x4c7   : > { %v849_v44 = vsel %vm516_vm3, %v2188_v43, 0.0 }
 0x4c8   : > { %850 = vadd.xlane.f32.xlu1 %v849_v44 }
 0x4ca   : > { %v2190_v45 = vpop.eup %2189 }
 0x4cb   : > { %v852_v46 = vsel %vm516_vm3, %v2190_v45, 0.0 }
 0x4cc   : > { %853 = vadd.xlane.f32.xlu1 %v852_v46 }
 0x4dd   : > { %1011 = vrot.lane.b32.xlu1 %v2389_v16, %s2254_s30 }
 0x4e1   : > { %1009 = vrot.lane.b32.xlu1 %v2403_v24, %s2255_s28 }
 0x551   : > { %v851_v48 = vpop.xlane.xlu1 %850 }
 0x552   : > { %2191 = vrcp.f32 %v851_v48 }
 0x555   : > { %v854_v49 = vpop.xlane.xlu1 %853 }
 0x556   : > { %2193 = vrcp.f32 %v854_v49 }
 0x559   : > { %v1012_v56 = vpop.permute.xlu1 %1011 }
 0x55a   : > { %v1017_v58 = vsel %vm516_vm3, %v1012_v56, 0 }
 0x55d   : > { %v1010_v60 = vpop.permute.xlu1 %1009 }
 0x55f   : > { %v2192_v50 = vpop.eup %2191 }
 0x560   : > { %v857_v51 = vmul.f32 %v2192_v50, %v2188_v43 }
 0x562   : > { %v859_v52 = vpack.c.bf16 %v857_v51, %v857_v51 }
 0x563   : > { %v2194_v53 = vpop.eup %2193 }
 0x564   : > { %2042 = vmatmul.mubr.msk.bf16.vlgmr.msra.gmra.mxu1 %vm516_vm3, %v859_v52  ;;  %v858_v55 = vmul.f32 %v2194_v53, %v2190_v45 }
 0x565   : > { %2052 = vmatpush3.bf16.xpose.msra.mxu1 %v967_v54  ;;  %2053 = vmatprep.mubr.msk.bf16.mxu1 %vm2248_vm1, %v2247_v3 }
 0x566   : > { %v860_v57 = vpack.c.bf16 %v858_v55, %v858_v55  ;;  %2063 = vmatprep.subr.bf16.mxu1 %v2247_v3 }
 0x568   : > { %2048 = vmatmul.mubr.msk.bf16.vlgmr.msra.gmra.mxu0 %vm516_vm3, %v860_v57 }
 0x569   : > { %2058 = vmatpush3.bf16.xpose.msra.mxu0 %v1017_v58  ;;  %2059 = vmatprep.mubr.msk.bf16.mxu0 %vm2248_vm1, %v2247_v3 }
 0x56a   : > { %2069 = vmatprep.subr.bf16.mxu0 %v2247_v3 }
 0x56c   : > { %2054 = vmatmul.mubr.msk.bf16.vlgmr.msra.gmra.mxu1 %vm516_vm3, %v960_v59 }
 0x56d   : > { %2065 = vmatprep.mubr.msk.bf16.mxu1 %vm2248_vm1, %v2247_v3 }
 0x570   : > { %2060 = vmatmul.mubr.msk.bf16.vlgmr.msra.gmra.mxu0 %vm516_vm3, %v1010_v60 }
 0x571   : > { %2071 = vmatprep.mubr.msk.bf16.mxu0 %vm2248_vm1, %v2247_v3 }
 0x624   : > { %v2489_v61 = vpop.f32.mrf.mxu1 }
 0x626   : > { %v2043_v62 = vpop.f32.mrf.mxu1 }
 0x628   : > { %v906_v63 = vpop.f32.mrf.mxu1  ;;  %v2491_v0 = vpop.f32.mrf.mxu0 }
 0x62a   : > { %v2044_v1 = vpop.f32.mrf.mxu1  ;;  %v2049_v2 = vpop.f32.mrf.mxu0 }
 0x62c   : > { %v954_v7 = vpop.f32.mrf.mxu0  ;;  %v1003_v9 = vpop.f32.mrf.mxu1 }
 0x62d   : > { %v1004_v11 = vadd.f32 %v2412_v25, %v1003_v9 }
 0x62e   : > { %v2050_v13 = vpop.f32.mrf.mxu0  ;;  %v2055_v14 = vpop.f32.mrf.mxu1 }
 0x62f   : > { %v1059_v15 = vsel %vm516_vm3, %v1004_v11, -inf }
 0x630   : > { %1060 = vmax.xlane.f32.xlu0 %v1059_v15  ;;  %v1006_v17 = vpop.f32.mrf.mxu1  ;;  %v1053_v18 = vpop.f32.mrf.mxu0 }
 0x631   : > { %v1054_v19 = vadd.f32 %v2418_v29, %v1053_v18 }
 0x632   : > { %v2056_v20 = vpop.f32.mrf.mxu1  ;;  %v2061_v21 = vpop.f32.mrf.mxu0 }
 0x633   : > { %v1062_v23 = vsel %vm516_vm3, %v1054_v19, -inf  ;;  %v958_v21 = vpack.c.bf16 %v2491_v0, %v2491_v0 }
 0x634   : > { %1063 = vmax.xlane.f32.xlu1 %v1062_v23  ;;  %v1056_v26 = vpop.f32.mrf.mxu0 }
 0x636   : > { %v2062_v27 = vpop.f32.mrf.mxu0 }
 0x645   : > { %1083 = vrot.lane.b32.xlu1 %v2384_v12, %s2256_s14 }
 0x649   : > { %1183 = vrot.lane.b32.xlu1 %v2384_v12, %s2257_s24 }
 0x64d   : > { %1233 = vrot.lane.b32.xlu1 %v2389_v16, %s2257_s24 }
 0x651   : > { %1231 = vrot.lane.b32.xlu1 %v2403_v24, %s2258_s15 }
 0x6b9   : > { %v1061_v28 = vpop.xlane.xlu0 %1060 }
 0x6ba   : > { %v1065_v30 = vsub.f32 %v1004_v11, %v1061_v28 }
 0x6bc   : > { %v1067_v31 = vmul.f32 1.442695, %v1065_v30 }
 0x6bd   : > { %v1064_v32 = vpop.xlane.xlu1 %1063 }
 0x6be   : > { %2195 = vpow2.f32 %v1067_v31  ;;  %v1066_v33 = vsub.f32 %v1054_v19, %v1064_v32 }
 0x6c0   : > { %v1069_v34 = vmul.f32 1.442695, %v1066_v33 }
 0x6c1   : > { %v1084_v35 = vpop.permute.xlu1 %1083 }
 0x6c2   : > { %2197 = vpow2.f32 %v1069_v34  ;;  %v1089_v36 = vsel %vm641_vm4, %v1084_v35, 0 }
 0x6c3   : > { %2064 = vmatpush3.bf16.msra.mxu1 %v1089_v36 }
 0x6c4   : > { %2075 = vmatprep.subr.bf16.mxu1 %v2247_v3 }
 0x6c5   : > { %v1184_v45 = vpop.permute.xlu1 %1183 }
 0x6c6   : > { %v1189_v49 = vsel %vm516_vm3, %v1184_v45, 0  ;;  %v2172_v45 = vld [vmem:[%s2328_s13] sm:$0xff]  }
 0x6c9   : > { %v1234_v50 = vpop.permute.xlu1 %1233 }
 0x6ca   : > { %v1239_v52 = vsel %vm516_vm3, %v1234_v50, 0 }
 0x6cb   : > { %v2196_v37 = vpop.eup %2195 }
 0x6cc   : > { %v1071_v38 = vsel %vm516_vm3, %v2196_v37, 0.0 }
 0x6cd   : > { %1072 = vadd.xlane.f32.xlu0 %v1071_v38  ;;  %v1232_v54 = vpop.permute.xlu1 %1231 }
 0x6cf   : > { %v2198_v39 = vpop.eup %2197 }
 0x6d0   : > { %v1074_v24 = vsel %vm516_vm3, %v2198_v39, 0.0 }
 0x6d1   : > { %1075 = vadd.xlane.f32.xlu0 %v1074_v24 }
 0x6e7   : > { %1131 = vrot.lane.b32.xlu0 %v2389_v16, %s2256_s14 }
 0x6eb   : > { %1181 = vrot.lane.b32.xlu0 %v2396_v22, %s2258_s15 }
 0x756   : > { %v1073_v40 = vpop.xlane.xlu0 %1072 }
 0x757   : > { %2199 = vrcp.f32 %v1073_v40 }
 0x75a   : > { %v1076_v41 = vpop.xlane.xlu0 %1075 }
 0x75b   : > { %2201 = vrcp.f32 %v1076_v41 }
 0x75e   : > { %v1132_v42 = vpop.permute.xlu0 %1131 }
 0x75f   : > { %v1137_v43 = vsel %vm641_vm4, %v1132_v42, 0 }
 0x760   : > { %2070 = vmatpush3.bf16.msra.mxu0 %v1137_v43 }
 0x761   : > { %2081 = vmatprep.subr.bf16.mxu0 %v2247_v3 }
 0x762   : > { %v1182_v53 = vpop.permute.xlu0 %1181 }
 0x764   : > { %v2200_v44 = vpop.eup %2199 }
 0x765   : > { %v1079_v46 = vmul.f32 %v2200_v44, %v2196_v37  ;;  %v2171_v44 = vld [vmem:[%s2328_s13 + $0x8] sm:$0xff]  }
 0x767   : > { %v1081_v47 = vpack.c.bf16 %v1079_v46, %v1079_v46 }
 0x768   : > { %v2202_v48 = vpop.eup %2201 }
 0x769   : > { %2066 = vmatmul.mubr.msk.bf16.vlgmr.msra.gmra.mxu1 %vm516_vm3, %v1081_v47  ;;  %v1080_v22 = vmul.f32 %v2202_v48, %v2198_v39 }
 0x76a   : > { %2076 = vmatpush3.bf16.xpose.msra.mxu1 %v1189_v49  ;;  %2077 = vmatprep.mubr.msk.bf16.mxu1 %vm2248_vm1, %v2247_v3 }
 0x76b   : > { %v1082_v51 = vpack.c.bf16 %v1080_v22, %v1080_v22  ;;  %2087 = vmatprep.subr.bf16.mxu1 %v2247_v3 }
 0x76d   : > { %2072 = vmatmul.mubr.msk.bf16.vlgmr.msra.gmra.mxu0 %vm516_vm3, %v1082_v51 }
 0x76e   : > { %2082 = vmatpush3.bf16.xpose.msra.mxu0 %v1239_v52  ;;  %2083 = vmatprep.mubr.msk.bf16.mxu0 %vm2248_vm1, %v2247_v3 }
 0x76f   : > { %2093 = vmatprep.subr.bf16.mxu0 %v2247_v3 }
 0x771   : > { %2078 = vmatmul.mubr.msk.bf16.vlgmr.msra.gmra.mxu1 %vm516_vm3, %v1182_v53 }
 0x772   : > { %2089 = vmatprep.mubr.msk.bf16.mxu1 %vm2248_vm1, %v2247_v3 }
 0x775   : > { %2084 = vmatmul.mubr.msk.bf16.vlgmr.msra.gmra.mxu0 %vm516_vm3, %v1232_v54 }
 0x776   : > { %2095 = vmatprep.mubr.msk.bf16.mxu0 %vm2248_vm1, %v2247_v3 }
 0x829   : > { %v1125_v55 = vpop.f32.mrf.mxu1 }
 0x82a   : > { %v1179_v35 = vpack.c.bf16 %v1125_v55, %v1125_v55 }
 0x82b   : > { %v2067_v56 = vpop.f32.mrf.mxu1 }
 0x82d   : > { %v1128_v57 = vpop.f32.mrf.mxu1  ;;  %v1173_v58 = vpop.f32.mrf.mxu0 }
 0x82f   : > { %v2068_v59 = vpop.f32.mrf.mxu1  ;;  %v2073_v60 = vpop.f32.mrf.mxu0 }
 0x830   : > { %v733_v59 = vpack.c.bf16 %v2453_v4, %v2453_v4  ;;  %v734_v60 = vpack.c.bf16 %v2455_v10, %v2455_v10 }
 0x831   : > { %v1176_v62 = vpop.f32.mrf.mxu0  ;;  %v1225_v63 = vpop.f32.mrf.mxu1 }
 0x832   : > { %v1226_v1 = vadd.f32 %v2412_v25, %v1225_v63  ;;  %v957_v25 = vpack.c.bf16 %v2489_v61, %v2489_v61 }
 0x833   : > { %v2074_v2 = vpop.f32.mrf.mxu0  ;;  %v2079_v7 = vpop.f32.mrf.mxu1 }
 0x834   : > { %v1281_v9 = vsel %vm516_vm3, %v1226_v1, -inf }
 0x835   : > { %1282 = vmax.xlane.f32.xlu0 %v1281_v9  ;;  %v1228_v11 = vpop.f32.mrf.mxu1  ;;  %v1275_v13 = vpop.f32.mrf.mxu0 }
 0x836   : > { %v1276_v14 = vadd.f32 %v2418_v29, %v1275_v13  ;;  %v1180_v29 = vpack.c.bf16 %v1173_v58, %v1173_v58 }
 0x837   : > { %v2080_v15 = vpop.f32.mrf.mxu1  ;;  %v2085_v17 = vpop.f32.mrf.mxu0 }
 0x838   : > { %v1284_v18 = vsel %vm516_vm3, %v1276_v14, -inf }
 0x839   : > { %1285 = vmax.xlane.f32.xlu1 %v1284_v18  ;;  %v1278_v19 = vpop.f32.mrf.mxu0 }
 0x83b   : > { %v2086_v20 = vpop.f32.mrf.mxu0 }
 0x84a   : > { %1305 = vrot.lane.b32.xlu1 %v2384_v12, %s2259_s17 }
 0x84e   : > { %1405 = vrot.lane.b32.xlu1 %v957_v25, %s2260_s18 }
 0x852   : > { %1407 = vrot.lane.b32.xlu1 %v958_v21, %s2260_s18 }
 0x856   : > { %1413 = vrot.lane.b32.xlu1 %v1180_v29, %s2261_s20 }
 0x8be   : > { %v1283_v23 = vpop.xlane.xlu0 %1282 }
 0x8bf   : > { %v1287_v26 = vsub.f32 %v1226_v1, %v1283_v23 }
 0x8c1   : > { %v1289_v27 = vmul.f32 1.442695, %v1287_v26 }
 0x8c2   : > { %v1286_v28 = vpop.xlane.xlu1 %1285 }
 0x8c3   : > { %2203 = vpow2.f32 %v1289_v27  ;;  %v1288_v30 = vsub.f32 %v1276_v14, %v1286_v28 }
 0x8c5   : > { %v1291_v31 = vmul.f32 1.442695, %v1288_v30 }
 0x8c6   : > { %v1306_v12 = vpop.permute.xlu1 %1305 }
 0x8c7   : > { %2205 = vpow2.f32 %v1291_v31  ;;  %v1311_v61 = vsel %vm641_vm4, %v1306_v12, 0 }
 0x8c8   : > { %2088 = vmatpush3.bf16.msra.mxu1 %v1311_v61 }
 0x8c9   : > { %2099 = vmatprep.subr.bf16.mxu1 %v2247_v3 }
 0x8ca   : > { %v1406_v55 = vpop.permute.xlu1 %1405 }
 0x8cb   : > { %v1423_v63 = vsel %vm516_vm3, %v733_v59, %v1406_v55 }
 0x8ce   : > { %v1408_v56 = vpop.permute.xlu1 %1407 }
 0x8cf   : > { %v1426_v1 = vsel %vm516_vm3, %v734_v60, %v1408_v56 }
 0x8d0   : > { %v2204_v32 = vpop.eup %2203 }
 0x8d1   : > { %v1293_v0 = vsel %vm516_vm3, %v2204_v32, 0.0 }
 0x8d2   : > { %1294 = vadd.xlane.f32.xlu0 %v1293_v0  ;;  %v1414_v58 = vpop.permute.xlu1 %1413  ;;  %v2173_v0 = vld [vmem:[%s2333_s16 + $0x8] sm:$0xff]  }
 0x8d4   : > { %v2206_v33 = vpop.eup %2205 }
 0x8d5   : > { %v1296_v34 = vsel %vm516_vm3, %v2206_v33, 0.0 }
 0x8d6   : > { %1297 = vadd.xlane.f32.xlu0 %v1296_v34 }
 0x8ec   : > { %1353 = vrot.lane.b32.xlu0 %v2389_v16, %s2259_s17 }
 0x8f0   : > { %1411 = vrot.lane.b32.xlu0 %v1179_v35, %s2261_s20 }
 0x95b   : > { %v1295_v36 = vpop.xlane.xlu0 %1294 }
 0x95c   : > { %2207 = vrcp.f32 %v1295_v36 }
 0x95f   : > { %v1298_v37 = vpop.xlane.xlu0 %1297 }
 0x960   : > { %2209 = vrcp.f32 %v1298_v37 }
 0x963   : > { %v1354_v38 = vpop.permute.xlu0 %1353 }
 0x964   : > { %v1359_v39 = vsel %vm641_vm4, %v1354_v38, 0 }
 0x965   : > { %2094 = vmatpush3.bf16.msra.mxu0 %v1359_v39 }
 0x966   : > { %2107 = vmatprep.subr.bf16.mxu0 %v2247_v3 }
 0x967   : > { %v1412_v57 = vpop.permute.xlu0 %1411 }
 0x968   : > { %v1429_v2 = vsel %vm1427_vm5, %v1423_v63, %v1412_v57 }
 0x969   : > { %v2208_v24 = vpop.eup %2207 }
 0x96a   : > { %v1301_v40 = vmul.f32 %v2208_v24, %v2204_v32 }
 0x96c   : > { %v1303_v41 = vpack.c.bf16 %v1301_v40, %v1301_v40 }
 0x96d   : > { %v2210_v42 = vpop.eup %2209 }
 0x96e   : > { %2090 = vmatmul.mubr.msk.bf16.vlgmr.msra.gmra.mxu1 %vm516_vm3, %v1303_v41  ;;  %v1302_v16 = vmul.f32 %v2210_v42, %v2206_v33  ;;  %v2174_v33 = vld [vmem:[%s2333_s16] sm:$0xff]  }
 0x96f   : > { %2103 = vmatprep.mubr.msk.bf16.mxu1 %vm2248_vm1, %v2247_v3  ;;  %2100 = vmatpush3.bf16.msra.mxu1 %v2171_v44 }
 0x970   : > { %v1304_v43 = vpack.c.bf16 %v1302_v16, %v1302_v16  ;;  %2101 = vmatprep.subr.bf16.mxu1 %v2247_v3 }
 0x972   : > { %2096 = vmatmul.mubr.msk.bf16.vlgmr.msra.gmra.mxu0 %vm516_vm3, %v1304_v43 }
 0x973   : > { %2111 = vmatprep.mubr.msk.bf16.mxu0 %vm2248_vm1, %v2247_v3  ;;  %2102 = vmatpush3.bf16.msra.mxu1 %v2172_v45 }
 0x974   : > { %2115 = vmatprep.subr.bf16.mxu1 %v2247_v3  ;;  %2108 = vmatpush3.bf16.msra.mxu0 %v2173_v0 }
 0x975   : > { %2109 = vmatprep.subr.bf16.mxu0 %v2247_v3 }
 0x978   : > { %2110 = vmatpush3.bf16.msra.mxu0 %v2174_v33 }
 0xa2e   : > { %v1347_v46 = vpop.f32.mrf.mxu1 }
 0xa2f   : > { %v1401_v47 = vpack.c.bf16 %v1347_v46, %v1347_v46 }
 0xa30   : > { %v2091_v48 = vpop.f32.mrf.mxu1 }
 0xa31   : > { %1417 = vrot.lane.b32.xlu0 %v1401_v47, %s2262_s21  ;;  %v2175_v48 = vld [vmem:[%s2338_s19 + $0x18] sm:$0xff]  }
 0xa32   : > { %v1350_v49 = vpop.f32.mrf.mxu1  ;;  %v1395_v22 = vpop.f32.mrf.mxu0 }
 0xa33   : > { %v1402_v50 = vpack.c.bf16 %v1395_v22, %v1395_v22  ;;  %v2176_v49 = vld [vmem:[%s2338_s19 + $0x10] sm:$0xff]   ;;  %v2177_v22 = vld [vmem:[%s2338_s19 + $0x8] sm:$0xff]  }
 0xa34   : > { %v2092_v51 = vpop.f32.mrf.mxu1  ;;  %v2097_v52 = vpop.f32.mrf.mxu0 }
 0xa35   : > { %1419 = vrot.lane.b32.xlu1 %v1402_v50, %s2262_s21  ;;  %1458 = vrot.lane.b32.xlu0 %v2381_v8, %s2263_s22  ;;  %v1431_v8 = vsel %vm1427_vm5, %v1426_v1, %v1414_v58  ;;  %v2178_v50 = vld [vmem:[%s2338_s19] sm:$0xff]  }
 0xa36   : > { %v1398_v53 = vpop.f32.mrf.mxu0 }
 0xa38   : > { %v2098_v54 = vpop.f32.mrf.mxu0 }
 0xaa3   : > { %v1418_v62 = vpop.permute.xlu0 %1417 }
 0xaa4   : > { %v1434_v9 = vsel %vm1432_vm6, %v1429_v2, %v1418_v62 }
 0xaa7   : > { %v1420_v7 = vpop.permute.xlu1 %1419  ;;  %v1459_v4 = vpop.permute.xlu0 %1458 }
 0xaa8   : > { %v1436_v11 = vsel %vm1432_vm6, %v1431_v8, %v1420_v7 }
 0xaa9   : > { %v1927_v13 = vcombine.low %v1434_v9, %v1436_v11 }
 0xaab   : > { %2104 = vmatmul.mubr.msk.bf16.vlgmr.msra.gmra.mxu1 %vm448_vm2, %v1927_v13 }
 0xaac   : > { %2123 = vmatprep.mubr.msk.bf16.mxu1 %vm2248_vm1, %v2247_v3  ;;  %2116 = vmatpush3.bf16.msra.mxu1 %v2175_v48 }
 0xaad   : > { %2117 = vmatprep.subr.bf16.mxu1 %v2247_v3 }
 0xab0   : > { %2118 = vmatpush3.bf16.msra.mxu1 %v2176_v49 }
 0xab1   : > { %2119 = vmatprep.subr.bf16.mxu1 %v2247_v3 }
 0xab4   : > { %2120 = vmatpush3.bf16.msra.mxu1 %v2177_v22 }
 0xab5   : > { %2121 = vmatprep.subr.bf16.mxu1 %v2247_v3 }
 0xab8   : > { %2122 = vmatpush3.bf16.msra.mxu1 %v2178_v50 }
 0xb6b   : > { %v1498_v10 = vpop.f32.mrf.mxu1 }
 0xb6c   : > { %v1499_v14 = vadd.f32 %v1498_v10, %v1459_v4 }
 0xb6d   : > { %v2105_v15 = vpop.f32.mrf.mxu1 }
 0xb6e   : > { %v1505_v17 = vadd.f32 %v1499_v14, %v2364_v5 }
 0xb6f   : > { %v1501_v18 = vpop.f32.mrf.mxu1 }
 0xb70   : > { %v1502_v19 = vadd.f32 %v1501_v18, %v1459_v4  ;;  %v1507_v20 = vsel %vm448_vm2, %v1505_v17, 0.0 }
 0xb71   : > { %1508 = vadd.xlane.f32.xlu1 %v1507_v20  ;;  %v2106_v25 = vpop.f32.mrf.mxu1 }
 0xb72   : > { %v1506_v21 = vadd.f32 %v1502_v19, %v2369_v6  ;;  %v1931_v6 = vld [vmem:[%s2343_s23 + $0x1] ss:$0 sm:$0xff]  ;;  %v1935_v19 = vld [vmem:[%s2343_s23 + $0x2] ss:$0 sm:$0xff] }
 0xb74   : > { %v1510_v29 = vsel %vm448_vm2, %v1506_v21, 0.0 }
 0xb75   : > { %1511 = vadd.xlane.f32.xlu0 %v1510_v29 }
 0xbfa   : > { %v1509_v23 = vpop.xlane.xlu1 %1508 }
 0xbfb   : > { %v1514_v26 = vmul.f32 0.03125, %v1509_v23 }
 0xbfd   : > { %v1516_v27 = vsub.f32 %v1505_v17, %v1514_v26 }
 0xbfe   : > { %v1512_v28 = vpop.xlane.xlu0 %1511 }
 0xbff   : > { %v1515_v30 = vmul.f32 0.03125, %v1512_v28  ;;  %v1518_v5 = vmul.f32 %v1516_v27, %v1516_v27 }
 0xc01   : > { %v1517_v31 = vsub.f32 %v1506_v21, %v1515_v30  ;;  %v1520_v12 = vsel %vm448_vm2, %v1518_v5, 0.0 }
 0xc02   : > { %1521 = vadd.xlane.f32.xlu0 %v1520_v12 }
 0xc03   : > { %v1519_v61 = vmul.f32 %v1517_v31, %v1517_v31 }
 0xc05   : > { %v1523_v32 = vsel %vm448_vm2, %v1519_v61, 0.0 }
 0xc06   : > { %1524 = vadd.xlane.f32.xlu1 %v1523_v32 }
 0xc17   : > { %1564 = vrot.lane.b32.xlu1 %v1931_v6, %s2250_s9 }
 0xc18   : > { %1542 = vrot.lane.b32.xlu0 %v1931_v6, %s2249_s10 }
 0xc8b   : > { %v1522_v34 = vpop.xlane.xlu0 %1521 }
 0xc8c   : > { %v1526_v35 = vmul.f32 0.03125, %v1522_v34 }
 0xc8e   : > { %v1528_v36 = vadd.f32 1e-05, %v1526_v35 }
 0xc8f   : > { %v1525_v37 = vpop.xlane.xlu1 %1524  ;;  %v1543_v43 = vpop.permute.xlu0 %1542 }
 0xc90   : > { %2211 = vrsqrt.f32 %v1528_v36  ;;  %v1527_v38 = vmul.f32 0.03125, %v1525_v37 }
 0xc92   : > { %v1529_v39 = vadd.f32 1e-05, %v1527_v38 }
 0xc93   : > { %v1565_v51 = vpop.permute.xlu1 %1564 }
 0xc94   : > { %2213 = vrsqrt.f32 %v1529_v39 }
 0xc9d   : > { %v2212_v24 = vpop.eup %2211 }
 0xc9e   : > { %v1532_v40 = vmul.f32 %v2212_v24, %v1516_v27 }
 0xca0   : > { %v1540_v16 = vmul.f32 %v1931_v6, %v1532_v40 }
 0xca1   : > { %v2214_v41 = vpop.eup %2213 }
 0xca2   : > { %v1533_v42 = vmul.f32 %v2214_v41, %v1517_v31  ;;  %v1545_v45 = vadd.f32 %v1543_v43, %v1540_v16 }
 0xca4   : > { %v1541_v44 = vmul.f32 %v1931_v6, %v1533_v42 }
 0xca6   : > { %v1546_v46 = vadd.f32 %v1543_v43, %v1541_v44 }
 0xca8   : > { %v1547_v47 = vpack.c.bf16 %v1546_v46, %v1545_v45 }
 0xcaa   : > { %2112 = vmatmul.mubr.msk.bf16.vlgmr.msra.gmra.mxu0 %vm448_vm2, %v1547_v47 }
 0xd6a   : > { %v1604_v52 = vpop.f32.mrf.mxu0 }
 0xd6b   : > { %v1605_v53 = vadd.f32 %v1604_v52, %v1565_v51 }
 0xd6c   : > { %v2113_v54 = vpop.f32.mrf.mxu0 }
 0xd6d   : > { %v1613_v55 = vmul.f32 0.044715, %v1605_v53  ;;  %v1611_v4 = vmul.f32 0.5, %v1605_v53 }
 0xd6e   : > { %v1607_v56 = vpop.f32.mrf.mxu0 }
 0xd6f   : > { %v1615_v57 = vmul.f32 %v1613_v55, %v1605_v53  ;;  %v1608_v58 = vadd.f32 %v1607_v56, %v1565_v51 }
 0xd70   : > { %v2114_v59 = vpop.f32.mrf.mxu0 }
 0xd71   : > { %v1617_v60 = vmul.f32 %v1615_v57, %v1605_v53  ;;  %v1614_v62 = vmul.f32 0.044715, %v1608_v58  ;;  %v1612_v10 = vmul.f32 0.5, %v1608_v58 }
 0xd73   : > { %v1619_v63 = vadd.f32 %v1617_v60, %v1605_v53  ;;  %v1616_v1 = vmul.f32 %v1614_v62, %v1608_v58 }
 0xd75   : > { %v1621_v8 = vmul.f32 0.7978846, %v1619_v63  ;;  %v1618_v2 = vmul.f32 %v1616_v1, %v1608_v58 }
 0xd77   : > { %2215 = vtanh.f32 %v1621_v8  ;;  %v1620_v7 = vadd.f32 %v1618_v2, %v1608_v58 }
 0xd79   : > { %v1622_v3 = vmul.f32 0.7978846, %v1620_v7 }
 0xd7b   : > { %2217 = vtanh.f32 %v1622_v3 }
 0xd84   : > { %v2216_v9 = vpop.eup %2215 }
 0xd85   : > { %v1625_v11 = vadd.f32 1.0, %v2216_v9 }
 0xd87   : > { %v1627_v15 = vmul.f32 %v1625_v11, %v1611_v4 }
 0xd88   : > { %v2218_v13 = vpop.eup %2217 }
 0xd89   : > { %v1626_v14 = vadd.f32 1.0, %v2218_v13 }
 0xd8b   : > { %v1628_v17 = vmul.f32 %v1626_v14, %v1612_v10 }
 0xd8d   : > { %v1629_v18 = vpack.c.bf16 %v1628_v17, %v1627_v15 }
 0xd8f   : > { %2124 = vmatmul.mubr.msk.bf16.vlgmr.msra.gmra.mxu1 %vm1668_vm7, %v1629_v18 }
 0xe4f   : > { %v1706_v20 = vpop.f32.mrf.mxu1 }
 0xe50   : > { %v1707_v25 = vadd.f32 %v1935_v19, %v1706_v20 }
 0xe51   : > { %v2125_v21 = vpop.f32.mrf.mxu1 }
 0xe52   : > { %v1713_v29 = vadd.f32 %v1707_v25, %v1545_v45 }
 0xe53   : > { %v1709_v23 = vpop.f32.mrf.mxu1 }
 0xe54   : > { %v1710_v26 = vadd.f32 %v1935_v19, %v1709_v23  ;;  %v1715_v27 = vsel %vm448_vm2, %v1713_v29, 0.0 }
 0xe55   : > { %1716 = vadd.xlane.f32.xlu1 %v1715_v27  ;;  %v2126_v28 = vpop.f32.mrf.mxu1 }
 0xe56   : > { %v1714_v30 = vadd.f32 %v1710_v26, %v1546_v46 }
 0xe58   : > { %v1718_v5 = vsel %vm448_vm2, %v1714_v30, 0.0 }
 0xe59   : > { %1719 = vadd.xlane.f32.xlu0 %v1718_v5 }
 0xede   : > { %v1717_v31 = vpop.xlane.xlu1 %1716 }
 0xedf   : > { %v1721_v12 = vmul.f32 0.03125, %v1717_v31 }
 0xee1   : > { %v1723_v61 = vsub.f32 %v1713_v29, %v1721_v12 }
 0xee2   : > { %v1720_v32 = vpop.xlane.xlu0 %1719 }
 0xee3   : > { %v1722_v6 = vmul.f32 0.03125, %v1720_v32  ;;  %v1725_v0 = vmul.f32 %v1723_v61, %v1723_v61 }
 0xee5   : > { %v1724_v33 = vsub.f32 %v1714_v30, %v1722_v6  ;;  %v1727_v34 = vsel %vm448_vm2, %v1725_v0, 0.0 }
 0xee6   : > { %1728 = vadd.xlane.f32.xlu0 %v1727_v34 }
 0xee7   : > { %v1726_v35 = vmul.f32 %v1724_v33, %v1724_v33 }
 0xee9   : > { %v1730_v36 = vsel %vm448_vm2, %v1726_v35, 0.0 }
 0xeea   : > { %1731 = vadd.xlane.f32.xlu1 %v1730_v36 }
 0xefb   : > { %1746 = vrot.lane.b32.xlu1 %v1935_v19, %s2250_s9 }
 0xefc   : > { %1741 = vrot.lane.b32.xlu0 %v1935_v19, %s2249_s10 }
 0xf6f   : > { %v1729_v37 = vpop.xlane.xlu0 %1728 }
 0xf70   : > { %v1733_v38 = vmul.f32 0.03125, %v1729_v37 }
 0xf72   : > { %v1735_v39 = vadd.f32 1e-05, %v1733_v38 }
 0xf73   : > { %v1732_v24 = vpop.xlane.xlu1 %1731  ;;  %v1742_v16 = vpop.permute.xlu0 %1741 }
 0xf74   : > { %2219 = vrsqrt.f32 %v1735_v39  ;;  %v1734_v40 = vmul.f32 0.03125, %v1732_v24 }
 0xf76   : > { %v1736_v41 = vadd.f32 1e-05, %v1734_v40 }
 0xf77   : > { %v1747_v44 = vpop.permute.xlu1 %1746 }
 0xf78   : > { %2221 = vrsqrt.f32 %v1736_v41 }
 0xf81   : > { %v2220_v42 = vpop.eup %2219 }
 0xf82   : > { %v1739_v43 = vmul.f32 %v2220_v42, %v1723_v61 }
 0xf84   : > { %v1744_v45 = vmul.f32 %v1742_v16, %v1739_v43 }
 0xf85   : > { %v2222_v46 = vpop.eup %2221 }
 0xf86   : > { %v1740_v47 = vmul.f32 %v2222_v46, %v1724_v33  ;;  %v1749_v48 = vadd.f32 %v1747_v44, %v1744_v45 }
 0xf88   : > { %v1745_v49 = vmul.f32 %v1742_v16, %v1740_v47  ;;  %1751 = vst.msk [vmem:[%s2612_s7] sm:$0xff] %vm448_vm2, %v1749_v48 }
 0xf8a   : > { %v1750_v22 = vadd.f32 %v1747_v44, %v1745_v49 }
 0xf8c   : > { %1752 = vst.msk [vmem:[%s2612_s7 + $0x8] sm:$0xff] %vm448_vm2, %v1750_v22 }
 0xf8d PF: > { %s17_s26 = sadd.s32 1, %s2245_s26   ;;  %s2613_s24 = smov %s2241_s25 }
 0xf8e   : > { %p14_p6 = scmp.ge.s32.totalorder %s17_s26, 4   ;;  %s2614_s25 = smov %s2616_s27 }
 0xf90   :  { %16 = sbr.rel (!%p14_p6) target bundleno = 2 (0x2), region = 100 }

</bundles_post_ra>
